<compile_context>
chip_gen: v7x
topology: tpu7x:2x2x1
jax: 0.10.0
libtpu: 0.0.40
codegen_flags: <defaults>
</compile_context>

<pallas_src>
import functools

import jax
import jax.numpy as jnp
from jax import lax
from jax.experimental import pallas as pl
from jax.experimental.pallas import tpu as pltpu


# ---------------------------------------------------------------------------
# Pallas kernels
# ---------------------------------------------------------------------------

def _matmul_bias_kernel(apply_relu, has_res, *refs):
    """Conv as one lane-dense matmul: (Cout,K)x(K,T) + bias [+ res] [+ ReLU]."""
    if has_res:
        x_ref, w_ref, b_ref, res_ref, o_ref = refs
    else:
        x_ref, w_ref, b_ref, o_ref = refs
    # bf16 operands, f32 accumulate on the MXU; epilogue in f32 (v5e-safe).
    acc = jnp.dot(w_ref[...], x_ref[0], preferred_element_type=jnp.float32)
    y = acc + b_ref[...]                       # (Cout, 1) bias broadcast over lanes
    if has_res:
        y = y + res_ref[0]                     # fused residual add
    if apply_relu:
        y = jnp.maximum(y, 0.0)                # fused ReLU
    o_ref[...] = y[None].astype(o_ref.dtype)


def _convcat_cam_kernel(x_ref, w_ref, b_ref, g_ref, o_ref):
    """conv_cat (single matmul) fused with DANet CAM channel attention."""
    y = jnp.dot(w_ref[...], x_ref[0], preferred_element_type=jnp.float32)
    y = y + b_ref[...]                                            # (C, HW) f32
    energy = jnp.dot(y, y.T, preferred_element_type=jnp.float32)  # (C, C) gram
    e_new = jnp.max(energy, axis=-1, keepdims=True) - energy
    p = jnp.exp(e_new - jnp.max(e_new, axis=-1, keepdims=True))   # stable softmax
    att = p / jnp.sum(p, axis=-1, keepdims=True)
    out = jnp.dot(att, y, preferred_element_type=jnp.float32)     # (C, HW)
    o_ref[...] = (g_ref[0, 0] * out + y)[None].astype(o_ref.dtype)


# ---------------------------------------------------------------------------
# Wrappers (glue + pallas_call plumbing)
# ---------------------------------------------------------------------------

_VMEM_LIMIT = 32 * 1024 * 1024  # explicit: safe on v5e/v6e (128 MiB) and v7x (64 MiB)


def _pick_tile(hw):
    """Largest lane tile (multiple of 128, >=512 preferred) dividing HW."""
    for t in (2048, 1024, 512, 256, 128):
        if hw % t == 0:
            return t
    return hw


def _im2col(x, offsets):
    """(N,C,H,W) -> (N, K*C, H*W): zero-padded taps concatenated on channels."""
    n, c, h, w = x.shape
    py = max(abs(dy) for dy, _ in offsets)
    px = max(abs(dx) for _, dx in offsets)
    xp = jnp.pad(x, ((0, 0), (0, 0), (py, py), (px, px)))
    taps = [xp[:, :, py + dy:py + dy + h, px + dx:px + dx + w]
            for dy, dx in offsets]
    return jnp.concatenate(taps, axis=1).reshape(n, len(offsets) * c, h * w)


def matmul_conv(x_k, w_mat, b, *, res=None, res_block=0, relu=False):
    """y[n] = w_mat @ x_k[n] + b  (+ res block) (+ ReLU), lane-dense (C, HW)."""
    n, k, hw = x_k.shape
    co = w_mat.shape[0]
    t = _pick_tile(hw)

    in_specs = [
        pl.BlockSpec((1, k, t), lambda i, j: (i, 0, j)),
        pl.BlockSpec((co, k), lambda i, j: (0, 0)),
        pl.BlockSpec((co, 1), lambda i, j: (0, 0)),
    ]
    args = [x_k.astype(jnp.bfloat16), w_mat.astype(jnp.bfloat16),
            b.reshape(co, 1).astype(jnp.float32)]
    if res is not None:
        # Residual is read straight out of a wider tensor (the fused 1x1 bank)
        # via its channel-block index -- no HBM slice copy.
        assert res.shape[1] % co == 0
        in_specs.append(pl.BlockSpec((1, co, t), lambda i, j: (i, res_block, j)))
        args.append(res.astype(jnp.float32))

    out = pl.pallas_call(
        functools.partial(_matmul_bias_kernel, relu, res is not None),
        out_shape=jax.ShapeDtypeStruct((n, co, hw), jnp.float32),
        grid=(n, hw // t),
        in_specs=in_specs,
        out_specs=pl.BlockSpec((1, co, t), lambda i, j: (i, 0, j)),
        compiler_params=pltpu.CompilerParams(
            dimension_semantics=("parallel", "parallel"),
            vmem_limit_bytes=_VMEM_LIMIT),
    )(*args)
    return out


def conv_pallas(x_nchw, w_hwio, b, *, dilation=1, res=None, res_block=0, relu=False):
    """General (dilated / asymmetric) conv via channel-axis im2col + one matmul."""
    kh, kw, ci, co = w_hwio.shape
    ph = dilation * (kh - 1) // 2
    pw = dilation * (kw - 1) // 2
    offs = [(i * dilation - ph, j * dilation - pw)
            for i in range(kh) for j in range(kw)]
    taps = _im2col(x_nchw.astype(jnp.bfloat16), offs)          # bf16 -> half HBM bytes
    w_mat = w_hwio.transpose(3, 0, 1, 2).reshape(co, kh * kw * ci)
    return matmul_conv(taps, w_mat, b, res=res, res_block=res_block, relu=relu)


def convcat_cam(taps, w_mat, b, gamma):
    """conv_cat + CAM channel attention fused (CAM is global over HW)."""
    n, k, hw = taps.shape
    co = w_mat.shape[0]
    # TODO(synk): for very large HW, tile the conv_cat matmul and run CAM as a
    # second pass (CAM's HW-global gram prevents HW tiling inside this kernel).
    return pl.pallas_call(
        _convcat_cam_kernel,
        out_shape=jax.ShapeDtypeStruct((n, co, hw), jnp.float32),
        grid=(n,),
        in_specs=[
            pl.BlockSpec((1, k, hw), lambda i: (i, 0, 0)),
            pl.BlockSpec((co, k), lambda i: (0, 0)),
            pl.BlockSpec((co, 1), lambda i: (0, 0)),
            pl.BlockSpec((1, 1), lambda i: (0, 0)),
        ],
        out_specs=pl.BlockSpec((1, co, hw), lambda i: (i, 0, 0)),
        compiler_params=pltpu.CompilerParams(
            dimension_semantics=("parallel",),
            vmem_limit_bytes=_VMEM_LIMIT),
    )(taps.astype(jnp.bfloat16), w_mat.astype(jnp.bfloat16),
      b.reshape(co, 1).astype(jnp.float32),
      jnp.asarray(gamma, jnp.float32).reshape(1, 1))


# ---------------------------------------------------------------------------
# Parameters (deterministic synthetic init, mirroring HAM.__init__ layout)
# ---------------------------------------------------------------------------

def init_params(key, cin, cout):
    # PyTorch init: weight ~ N(0, 0.01), bias = 0, CAM gamma = 0.  Small random
    # biases and gamma=0.5 are used here so those code paths are exercised.
    def conv(k, kh, kw, ci, co):
        kw_, kb_ = jax.random.split(k)
        return {"w": 0.01 * jax.random.normal(kw_, (kh, kw, ci, co), jnp.float32),
                "b": 0.01 * jax.random.normal(kb_, (co,), jnp.float32)}

    keys = iter(jax.random.split(key, 20))
    p = {"branch0": conv(next(keys), 1, 1, cin, cout)}
    for i, s in enumerate((3, 5, 7, 9), start=1):
        p[f"b{i}_1x1"] = conv(next(keys), 1, 1, cin, cout)
        p[f"b{i}_1xk"] = conv(next(keys), 1, s, cout, cout)
        p[f"b{i}_kx1"] = conv(next(keys), s, 1, cout, cout)
        p[f"b{i}_dil"] = conv(next(keys), 3, 3, cout, cout)
    p["conv_cat"] = conv(next(keys), 3, 3, 5 * cout, cout)
    p["conv_res"] = conv(next(keys), 1, 1, cin, cout)
    p["conv1"] = conv(next(keys), 3, 3, cout, cout)
    p["gamma"] = jnp.array(0.5, jnp.float32)
    return p


# ---------------------------------------------------------------------------
# Forward pass (mirrors HAM.forward)
# ---------------------------------------------------------------------------

_BANK_ORDER = ("branch0", "b1_1x1", "b2_1x1", "b3_1x1", "b4_1x1", "conv_res")


def ham_forward(params, x):
    n, cin, h, w = x.shape
    hw = h * w
    assert hw % 128 == 0, "flattened spatial dim must be a multiple of 128"
    cout = params["branch0"]["w"].shape[-1]

    # --- fused bank of six 1x1 convs: branch0..4 entries + conv_res ---------
    w_bank = jnp.concatenate([params[k]["w"] for k in _BANK_ORDER],
                             axis=-1)[0, 0].T                 # (6C, Cin)
    b_bank = jnp.concatenate([params[k]["b"] for k in _BANK_ORDER])
    bank = matmul_conv(x.astype(jnp.bfloat16).reshape(n, cin, hw),
                       w_bank, b_bank)                        # (N, 6C, HW) f32

    # --- branches 1..4: (1,s) -> (s,1) -> 3x3 dilated ------------------------
    branch_outs = [bank[:, 0:cout]]                           # branch0 output
    for i, s in enumerate((3, 5, 7, 9), start=1):
        t = bank[:, i * cout:(i + 1) * cout].reshape(n, cout, h, w)
        t = conv_pallas(t, params[f"b{i}_1xk"]["w"], params[f"b{i}_1xk"]["b"])
        t = conv_pallas(t.reshape(n, cout, h, w),
                        params[f"b{i}_kx1"]["w"], params[f"b{i}_kx1"]["b"])
        t = conv_pallas(t.reshape(n, cout, h, w),
                        params[f"b{i}_dil"]["w"], params[f"b{i}_dil"]["b"],
                        dilation=s)
        branch_outs.append(t)

    # --- concat -> conv_cat + CAM channel attention (fused kernel) -----------
    x_cat = jnp.concatenate(branch_outs, axis=1).reshape(n, 5 * cout, h, w)
    offs3 = [(i - 1, j - 1) for i in range(3) for j in range(3)]
    taps_cat = _im2col(x_cat.astype(jnp.bfloat16), offs3)     # (N, 45C, HW)
    w_cat = params["conv_cat"]["w"].transpose(3, 0, 1, 2).reshape(cout, -1)
    x_cam = convcat_cam(taps_cat, w_cat, params["conv_cat"]["b"],
                        params["gamma"])                      # (N, C, HW)

    # --- conv1 + conv_res residual + final ReLU (fused epilogue) -------------
    out = conv_pallas(x_cam.reshape(n, cout, h, w),
                      params["conv1"]["w"], params["conv1"]["b"],
                      res=bank, res_block=5, relu=True)
    return out.reshape(n, cout, h, w)


# ---------------------------------------------------------------------------
# Pure-JAX f32 reference (XLA convs) for a sanity check
# ---------------------------------------------------------------------------

def _ref_conv(t, p, dilation=1):
    kh, kw, _, _ = p["w"].shape
    ph = dilation * (kh - 1) // 2
    pw = dilation * (kw - 1) // 2
    y = lax.conv_general_dilated(t, p["w"], (1, 1), [(ph, ph), (pw, pw)],
                                 rhs_dilation=(dilation, dilation),
                                 dimension_numbers=("NCHW", "HWIO", "NCHW"))
    return y + p["b"].reshape(1, -1, 1, 1)


def _ref_cam(x, gamma):
    n, c, h, w = x.shape
    q = x.reshape(n, c, h * w)
    energy = jnp.einsum("ncx,ndx->ncd", q, q)
    e_new = jnp.max(energy, axis=-1, keepdims=True) - energy
    att = jax.nn.softmax(e_new, axis=-1)
    out = jnp.einsum("ncd,ndx->ncx", att, q).reshape(n, c, h, w)
    return gamma * out + x


def ref_forward(params, x):
    outs = [_ref_conv(x, params["branch0"])]
    for i, s in enumerate((3, 5, 7, 9), start=1):
        t = _ref_conv(x, params[f"b{i}_1x1"])
        t = _ref_conv(t, params[f"b{i}_1xk"])
        t = _ref_conv(t, params[f"b{i}_kx1"])
        t = _ref_conv(t, params[f"b{i}_dil"], dilation=s)
        outs.append(t)
    xc = _ref_conv(jnp.concatenate(outs, axis=1), params["conv_cat"])
    xc = _ref_cam(xc, params["gamma"])
    xc = _ref_conv(xc, params["conv1"])
    return jnp.maximum(xc + _ref_conv(x, params["conv_res"]), 0.0)


if __name__ == "__main__":
    key = jax.random.PRNGKey(0)
    kp, kx = jax.random.split(key)
    N, CIN, COUT, H, W = 2, 16, 8, 16, 16            # HW = 256 (multiple of 128)
    params = init_params(kp, CIN, COUT)
    x = jax.random.normal(kx, (N, CIN, H, W), jnp.float32)   # PyTorch NCHW layout

    out = jax.block_until_ready(jax.jit(ham_forward)(params, x))
    ref = jax.block_until_ready(jax.jit(ref_forward)(params, x))

    assert out.shape == (N, COUT, H, W), out.shape
    scale = float(jnp.max(jnp.abs(ref))) + 1e-6
    err = float(jnp.max(jnp.abs(out - ref)))
    assert err <= 5e-2 * scale + 1e-5, f"mismatch: abs err {err}, ref scale {scale}"
    print("KERNEL_OK")
</pallas_src>

<mosaic_0001>
module attributes {stable_mosaic.version = 11 : i64} {
  func.func @_matmul_bias_kernel(%arg0: i32, %arg1: i32, %arg2: memref<1x16x256xbf16, #tpu.memory_space<vmem>>, %arg3: memref<48x16xbf16, #tpu.memory_space<vmem>>, %arg4: memref<48x1xf32, #tpu.memory_space<vmem>>, %arg5: memref<1x48x256xf32, #tpu.memory_space<vmem>>) attributes {dimension_semantics = [#tpu.dimension_semantics<parallel>, #tpu.dimension_semantics<parallel>], iteration_bounds = array<i64: 2, 1>, scalar_prefetch = 0 : i64, scratch_operands = 0 : i64, tpu.core_type = #tpu.core_type<tc>, window_params = [{transform_indices = @transform_0, window_bounds = array<i64: 1, 16, 256>}, {pipeline_mode = #tpu.pipeline_mode<synchronous>, transform_indices = @transform_1, window_bounds = array<i64: 48, 16>}, {pipeline_mode = #tpu.pipeline_mode<synchronous>, transform_indices = @transform_2, window_bounds = array<i64: 48, 1>}, {transform_indices = @transform_3, window_bounds = array<i64: 1, 48, 256>}]} {
    %c0 = arith.constant 0 : index
    %c0_0 = arith.constant 0 : index
    %0 = vector.load %arg3[%c0, %c0_0] : memref<48x16xbf16, #tpu.memory_space<vmem>>, vector<48x16xbf16>
    %c0_1 = arith.constant 0 : index
    %c0_2 = arith.constant 0 : index
    %c0_3 = arith.constant 0 : index
    %1 = vector.load %arg2[%c0_1, %c0_2, %c0_3] : memref<1x16x256xbf16, #tpu.memory_space<vmem>>, vector<1x16x256xbf16>
    %2 = vector.shape_cast %1 : vector<1x16x256xbf16> to vector<16x256xbf16>
    %cst = arith.constant dense<0.000000e+00> : vector<48x256xf32>
    %3 = tpu.matmul %0, %2, %cst {dimension_numbers = #tpu.dot_dimension_numbers<[1], [0], [0], [1], [0, 0, 1, 1], [], []>} : vector<48x16xbf16>, vector<16x256xbf16>, vector<48x256xf32> -> vector<48x256xf32>
    %c0_4 = arith.constant 0 : index
    %c0_5 = arith.constant 0 : index
    %4 = vector.load %arg4[%c0_4, %c0_5] : memref<48x1xf32, #tpu.memory_space<vmem>>, vector<48x1xf32>
    %5 = vector.broadcast %4 : vector<48x1xf32> to vector<48x256xf32>
    %6 = arith.addf %3, %5 : vector<48x256xf32>
    %7 = vector.shape_cast %6 : vector<48x256xf32> to vector<1x48x256xf32>
    %c0_6 = arith.constant 0 : index
    %c0_7 = arith.constant 0 : index
    %c0_8 = arith.constant 0 : index
    %8 = vector.load %arg5[%c0_6, %c0_7, %c0_8] : memref<1x48x256xf32, #tpu.memory_space<vmem>>, vector<1x48x256xf32>
    tpu.vector_store %arg5[%c0_6, %c0_7, %c0_8], %7 {strides = array<i32>} : memref<1x48x256xf32, #tpu.memory_space<vmem>>, vector<1x48x256xf32>,
    return
  }
  func.func @transform_0(%arg0: i32, %arg1: i32) -> (i32, i32, i32) {
    %c0_i32 = arith.constant 0 : i32
    %c0_i32_0 = arith.constant 0 : i32
    return %arg0, %c0_i32, %arg1 : i32, i32, i32
  }
  func.func @transform_1(%arg0: i32, %arg1: i32) -> (i32, i32) {
    %c0_i32 = arith.constant 0 : i32
    %c0_i32_0 = arith.constant 0 : i32
    %c0_i32_1 = arith.constant 0 : i32
    return %c0_i32, %c0_i32_0 : i32, i32
  }
  func.func @transform_2(%arg0: i32, %arg1: i32) -> (i32, i32) {
    %c0_i32 = arith.constant 0 : i32
    %c0_i32_0 = arith.constant 0 : i32
    %c0_i32_1 = arith.constant 0 : i32
    return %c0_i32, %c0_i32_0 : i32, i32
  }
  func.func @transform_3(%arg0: i32, %arg1: i32) -> (i32, i32, i32) {
    %c0_i32 = arith.constant 0 : i32
    %c0_i32_0 = arith.constant 0 : i32
    return %arg0, %c0_i32, %arg1 : i32, i32, i32
  }
}

module attributes {stable_mosaic.version = 11 : i64} {
  func.func @_matmul_bias_kernel(%arg0: i32, %arg1: i32, %arg2: memref<1x72x256xbf16, #tpu.memory_space<vmem>>, %arg3: memref<8x72xbf16, #tpu.memory_space<vmem>>, %arg4: memref<8x1xf32, #tpu.memory_space<vmem>>, %arg5: memref<1x8x256xf32, #tpu.memory_space<vmem>>) attributes {dimension_semantics = [#tpu.dimension_semantics<parallel>, #tpu.dimension_semantics<parallel>], iteration_bounds = array<i64: 2, 1>, scalar_prefetch = 0 : i64, scratch_operands = 0 : i64, tpu.core_type = #tpu.core_type<tc>, window_params = [{transform_indices = @transform_0, window_bounds = array<i64: 1, 72, 256>}, {pipeline_mode = #tpu.pipeline_mode<synchronous>, transform_indices = @transform_1, window_bounds = array<i64: 8, 72>}, {pipeline_mode = #tpu.pipeline_mode<synchronous>, transform_indices = @transform_2, window_bounds = array<i64: 8, 1>}, {transform_indices = @transform_3, window_bounds = array<i64: 1, 8, 256>}]} {
    %c0 = arith.constant 0 : index
    %c0_0 = arith.constant 0 : index
    %0 = vector.load %arg3[%c0, %c0_0] : memref<8x72xbf16, #tpu.memory_space<vmem>>, vector<8x72xbf16>
    %c0_1 = arith.constant 0 : index
    %c0_2 = arith.constant 0 : index
    %c0_3 = arith.constant 0 : index
    %1 = vector.load %arg2[%c0_1, %c0_2, %c0_3] : memref<1x72x256xbf16, #tpu.memory_space<vmem>>, vector<1x72x256xbf16>
    %2 = vector.shape_cast %1 : vector<1x72x256xbf16> to vector<72x256xbf16>
    %cst = arith.constant dense<0.000000e+00> : vector<8x256xf32>
    %3 = tpu.matmul %0, %2, %cst {dimension_numbers = #tpu.dot_dimension_numbers<[1], [0], [0], [1], [0, 0, 1, 1], [], []>} : vector<8x72xbf16>, vector<72x256xbf16>, vector<8x256xf32> -> vector<8x256xf32>
    %c0_4 = arith.constant 0 : index
    %c0_5 = arith.constant 0 : index
    %4 = vector.load %arg4[%c0_4, %c0_5] : memref<8x1xf32, #tpu.memory_space<vmem>>, vector<8x1xf32>
    %5 = vector.broadcast %4 : vector<8x1xf32> to vector<8x256xf32>
    %6 = arith.addf %3, %5 : vector<8x256xf32>
    %7 = vector.shape_cast %6 : vector<8x256xf32> to vector<1x8x256xf32>
    %c0_6 = arith.constant 0 : index
    %c0_7 = arith.constant 0 : index
    %c0_8 = arith.constant 0 : index
    %8 = vector.load %arg5[%c0_6, %c0_7, %c0_8] : memref<1x8x256xf32, #tpu.memory_space<vmem>>, vector<1x8x256xf32>
    tpu.vector_store %arg5[%c0_6, %c0_7, %c0_8], %7 {strides = array<i32>} : memref<1x8x256xf32, #tpu.memory_space<vmem>>, vector<1x8x256xf32>,
    return
  }
  func.func @transform_0(%arg0: i32, %arg1: i32) -> (i32, i32, i32) {
    %c0_i32 = arith.constant 0 : i32
    %c0_i32_0 = arith.constant 0 : i32
    return %arg0, %c0_i32, %arg1 : i32, i32, i32
  }
  func.func @transform_1(%arg0: i32, %arg1: i32) -> (i32, i32) {
    %c0_i32 = arith.constant 0 : i32
    %c0_i32_0 = arith.constant 0 : i32
    %c0_i32_1 = arith.constant 0 : i32
    return %c0_i32, %c0_i32_0 : i32, i32
  }
  func.func @transform_2(%arg0: i32, %arg1: i32) -> (i32, i32) {
    %c0_i32 = arith.constant 0 : i32
    %c0_i32_0 = arith.constant 0 : i32
    %c0_i32_1 = arith.constant 0 : i32
    return %c0_i32, %c0_i32_0 : i32, i32
  }
  func.func @transform_3(%arg0: i32, %arg1: i32) -> (i32, i32, i32) {
    %c0_i32 = arith.constant 0 : i32
    %c0_i32_0 = arith.constant 0 : i32
    return %arg0, %c0_i32, %arg1 : i32, i32, i32
  }
}

module attributes {stable_mosaic.version = 11 : i64} {
  func.func @_matmul_bias_kernel(%arg0: i32, %arg1: i32, %arg2: memref<1x56x256xbf16, #tpu.memory_space<vmem>>, %arg3: memref<8x56xbf16, #tpu.memory_space<vmem>>, %arg4: memref<8x1xf32, #tpu.memory_space<vmem>>, %arg5: memref<1x8x256xf32, #tpu.memory_space<vmem>>) attributes {dimension_semantics = [#tpu.dimension_semantics<parallel>, #tpu.dimension_semantics<parallel>], iteration_bounds = array<i64: 2, 1>, scalar_prefetch = 0 : i64, scratch_operands = 0 : i64, tpu.core_type = #tpu.core_type<tc>, window_params = [{transform_indices = @transform_0, window_bounds = array<i64: 1, 56, 256>}, {pipeline_mode = #tpu.pipeline_mode<synchronous>, transform_indices = @transform_1, window_bounds = array<i64: 8, 56>}, {pipeline_mode = #tpu.pipeline_mode<synchronous>, transform_indices = @transform_2, window_bounds = array<i64: 8, 1>}, {transform_indices = @transform_3, window_bounds = array<i64: 1, 8, 256>}]} {
    %c0 = arith.constant 0 : index
    %c0_0 = arith.constant 0 : index
    %0 = vector.load %arg3[%c0, %c0_0] : memref<8x56xbf16, #tpu.memory_space<vmem>>, vector<8x56xbf16>
    %c0_1 = arith.constant 0 : index
    %c0_2 = arith.constant 0 : index
    %c0_3 = arith.constant 0 : index
    %1 = vector.load %arg2[%c0_1, %c0_2, %c0_3] : memref<1x56x256xbf16, #tpu.memory_space<vmem>>, vector<1x56x256xbf16>
    %2 = vector.shape_cast %1 : vector<1x56x256xbf16> to vector<56x256xbf16>
    %cst = arith.constant dense<0.000000e+00> : vector<8x256xf32>
    %3 = tpu.matmul %0, %2, %cst {dimension_numbers = #tpu.dot_dimension_numbers<[1], [0], [0], [1], [0, 0, 1, 1], [], []>} : vector<8x56xbf16>, vector<56x256xbf16>, vector<8x256xf32> -> vector<8x256xf32>
    %c0_4 = arith.constant 0 : index
    %c0_5 = arith.constant 0 : index
    %4 = vector.load %arg4[%c0_4, %c0_5] : memref<8x1xf32, #tpu.memory_space<vmem>>, vector<8x1xf32>
    %5 = vector.broadcast %4 : vector<8x1xf32> to vector<8x256xf32>
    %6 = arith.addf %3, %5 : vector<8x256xf32>
    %7 = vector.shape_cast %6 : vector<8x256xf32> to vector<1x8x256xf32>
    %c0_6 = arith.constant 0 : index
    %c0_7 = arith.constant 0 : index
    %c0_8 = arith.constant 0 : index
    %8 = vector.load %arg5[%c0_6, %c0_7, %c0_8] : memref<1x8x256xf32, #tpu.memory_space<vmem>>, vector<1x8x256xf32>
    tpu.vector_store %arg5[%c0_6, %c0_7, %c0_8], %7 {strides = array<i32>} : memref<1x8x256xf32, #tpu.memory_space<vmem>>, vector<1x8x256xf32>,
    return
  }
  func.func @transform_0(%arg0: i32, %arg1: i32) -> (i32, i32, i32) {
    %c0_i32 = arith.constant 0 : i32
    %c0_i32_0 = arith.constant 0 : i32
    return %arg0, %c0_i32, %arg1 : i32, i32, i32
  }
  func.func @transform_1(%arg0: i32, %arg1: i32) -> (i32, i32) {
    %c0_i32 = arith.constant 0 : i32
    %c0_i32_0 = arith.constant 0 : i32
    %c0_i32_1 = arith.constant 0 : i32
    return %c0_i32, %c0_i32_0 : i32, i32
  }
  func.func @transform_2(%arg0: i32, %arg1: i32) -> (i32, i32) {
    %c0_i32 = arith.constant 0 : i32
    %c0_i32_0 = arith.constant 0 : i32
    %c0_i32_1 = arith.constant 0 : i32
    return %c0_i32, %c0_i32_0 : i32, i32
  }
  func.func @transform_3(%arg0: i32, %arg1: i32) -> (i32, i32, i32) {
    %c0_i32 = arith.constant 0 : i32
    %c0_i32_0 = arith.constant 0 : i32
    return %arg0, %c0_i32, %arg1 : i32, i32, i32
  }
}

module attributes {stable_mosaic.version = 11 : i64} {
  func.func @_matmul_bias_kernel(%arg0: i32, %arg1: i32, %arg2: memref<1x40x256xbf16, #tpu.memory_space<vmem>>, %arg3: memref<8x40xbf16, #tpu.memory_space<vmem>>, %arg4: memref<8x1xf32, #tpu.memory_space<vmem>>, %arg5: memref<1x8x256xf32, #tpu.memory_space<vmem>>) attributes {dimension_semantics = [#tpu.dimension_semantics<parallel>, #tpu.dimension_semantics<parallel>], iteration_bounds = array<i64: 2, 1>, scalar_prefetch = 0 : i64, scratch_operands = 0 : i64, tpu.core_type = #tpu.core_type<tc>, window_params = [{transform_indices = @transform_0, window_bounds = array<i64: 1, 40, 256>}, {pipeline_mode = #tpu.pipeline_mode<synchronous>, transform_indices = @transform_1, window_bounds = array<i64: 8, 40>}, {pipeline_mode = #tpu.pipeline_mode<synchronous>, transform_indices = @transform_2, window_bounds = array<i64: 8, 1>}, {transform_indices = @transform_3, window_bounds = array<i64: 1, 8, 256>}]} {
    %c0 = arith.constant 0 : index
    %c0_0 = arith.constant 0 : index
    %0 = vector.load %arg3[%c0, %c0_0] : memref<8x40xbf16, #tpu.memory_space<vmem>>, vector<8x40xbf16>
    %c0_1 = arith.constant 0 : index
    %c0_2 = arith.constant 0 : index
    %c0_3 = arith.constant 0 : index
    %1 = vector.load %arg2[%c0_1, %c0_2, %c0_3] : memref<1x40x256xbf16, #tpu.memory_space<vmem>>, vector<1x40x256xbf16>
    %2 = vector.shape_cast %1 : vector<1x40x256xbf16> to vector<40x256xbf16>
    %cst = arith.constant dense<0.000000e+00> : vector<8x256xf32>
    %3 = tpu.matmul %0, %2, %cst {dimension_numbers = #tpu.dot_dimension_numbers<[1], [0], [0], [1], [0, 0, 1, 1], [], []>} : vector<8x40xbf16>, vector<40x256xbf16>, vector<8x256xf32> -> vector<8x256xf32>
    %c0_4 = arith.constant 0 : index
    %c0_5 = arith.constant 0 : index
    %4 = vector.load %arg4[%c0_4, %c0_5] : memref<8x1xf32, #tpu.memory_space<vmem>>, vector<8x1xf32>
    %5 = vector.broadcast %4 : vector<8x1xf32> to vector<8x256xf32>
    %6 = arith.addf %3, %5 : vector<8x256xf32>
    %7 = vector.shape_cast %6 : vector<8x256xf32> to vector<1x8x256xf32>
    %c0_6 = arith.constant 0 : index
    %c0_7 = arith.constant 0 : index
    %c0_8 = arith.constant 0 : index
    %8 = vector.load %arg5[%c0_6, %c0_7, %c0_8] : memref<1x8x256xf32, #tpu.memory_space<vmem>>, vector<1x8x256xf32>
    tpu.vector_store %arg5[%c0_6, %c0_7, %c0_8], %7 {strides = array<i32>} : memref<1x8x256xf32, #tpu.memory_space<vmem>>, vector<1x8x256xf32>,
    return
  }
  func.func @transform_0(%arg0: i32, %arg1: i32) -> (i32, i32, i32) {
    %c0_i32 = arith.constant 0 : i32
    %c0_i32_0 = arith.constant 0 : i32
    return %arg0, %c0_i32, %arg1 : i32, i32, i32
  }
  func.func @transform_1(%arg0: i32, %arg1: i32) -> (i32, i32) {
    %c0_i32 = arith.constant 0 : i32
    %c0_i32_0 = arith.constant 0 : i32
    %c0_i32_1 = arith.constant 0 : i32
    return %c0_i32, %c0_i32_0 : i32, i32
  }
  func.func @transform_2(%arg0: i32, %arg1: i32) -> (i32, i32) {
    %c0_i32 = arith.constant 0 : i32
    %c0_i32_0 = arith.constant 0 : i32
    %c0_i32_1 = arith.constant 0 : i32
    return %c0_i32, %c0_i32_0 : i32, i32
  }
  func.func @transform_3(%arg0: i32, %arg1: i32) -> (i32, i32, i32) {
    %c0_i32 = arith.constant 0 : i32
    %c0_i32_0 = arith.constant 0 : i32
    return %arg0, %c0_i32, %arg1 : i32, i32, i32
  }
}

module attributes {stable_mosaic.version = 11 : i64} {
  func.func @_matmul_bias_kernel(%arg0: i32, %arg1: i32, %arg2: memref<1x24x256xbf16, #tpu.memory_space<vmem>>, %arg3: memref<8x24xbf16, #tpu.memory_space<vmem>>, %arg4: memref<8x1xf32, #tpu.memory_space<vmem>>, %arg5: memref<1x8x256xf32, #tpu.memory_space<vmem>>) attributes {dimension_semantics = [#tpu.dimension_semantics<parallel>, #tpu.dimension_semantics<parallel>], iteration_bounds = array<i64: 2, 1>, scalar_prefetch = 0 : i64, scratch_operands = 0 : i64, tpu.core_type = #tpu.core_type<tc>, window_params = [{transform_indices = @transform_0, window_bounds = array<i64: 1, 24, 256>}, {pipeline_mode = #tpu.pipeline_mode<synchronous>, transform_indices = @transform_1, window_bounds = array<i64: 8, 24>}, {pipeline_mode = #tpu.pipeline_mode<synchronous>, transform_indices = @transform_2, window_bounds = array<i64: 8, 1>}, {transform_indices = @transform_3, window_bounds = array<i64: 1, 8, 256>}]} {
    %c0 = arith.constant 0 : index
    %c0_0 = arith.constant 0 : index
    %0 = vector.load %arg3[%c0, %c0_0] : memref<8x24xbf16, #tpu.memory_space<vmem>>, vector<8x24xbf16>
    %c0_1 = arith.constant 0 : index
    %c0_2 = arith.constant 0 : index
    %c0_3 = arith.constant 0 : index
    %1 = vector.load %arg2[%c0_1, %c0_2, %c0_3] : memref<1x24x256xbf16, #tpu.memory_space<vmem>>, vector<1x24x256xbf16>
    %2 = vector.shape_cast %1 : vector<1x24x256xbf16> to vector<24x256xbf16>
    %cst = arith.constant dense<0.000000e+00> : vector<8x256xf32>
    %3 = tpu.matmul %0, %2, %cst {dimension_numbers = #tpu.dot_dimension_numbers<[1], [0], [0], [1], [0, 0, 1, 1], [], []>} : vector<8x24xbf16>, vector<24x256xbf16>, vector<8x256xf32> -> vector<8x256xf32>
    %c0_4 = arith.constant 0 : index
    %c0_5 = arith.constant 0 : index
    %4 = vector.load %arg4[%c0_4, %c0_5] : memref<8x1xf32, #tpu.memory_space<vmem>>, vector<8x1xf32>
    %5 = vector.broadcast %4 : vector<8x1xf32> to vector<8x256xf32>
    %6 = arith.addf %3, %5 : vector<8x256xf32>
    %7 = vector.shape_cast %6 : vector<8x256xf32> to vector<1x8x256xf32>
    %c0_6 = arith.constant 0 : index
    %c0_7 = arith.constant 0 : index
    %c0_8 = arith.constant 0 : index
    %8 = vector.load %arg5[%c0_6, %c0_7, %c0_8] : memref<1x8x256xf32, #tpu.memory_space<vmem>>, vector<1x8x256xf32>
    tpu.vector_store %arg5[%c0_6, %c0_7, %c0_8], %7 {strides = array<i32>} : memref<1x8x256xf32, #tpu.memory_space<vmem>>, vector<1x8x256xf32>,
    return
  }
  func.func @transform_0(%arg0: i32, %arg1: i32) -> (i32, i32, i32) {
    %c0_i32 = arith.constant 0 : i32
    %c0_i32_0 = arith.constant 0 : i32
    return %arg0, %c0_i32, %arg1 : i32, i32, i32
  }
  func.func @transform_1(%arg0: i32, %arg1: i32) -> (i32, i32) {
    %c0_i32 = arith.constant 0 : i32
    %c0_i32_0 = arith.constant 0 : i32
    %c0_i32_1 = arith.constant 0 : i32
    return %c0_i32, %c0_i32_0 : i32, i32
  }
  func.func @transform_2(%arg0: i32, %arg1: i32) -> (i32, i32) {
    %c0_i32 = arith.constant 0 : i32
    %c0_i32_0 = arith.constant 0 : i32
    %c0_i32_1 = arith.constant 0 : i32
    return %c0_i32, %c0_i32_0 : i32, i32
  }
  func.func @transform_3(%arg0: i32, %arg1: i32) -> (i32, i32, i32) {
    %c0_i32 = arith.constant 0 : i32
    %c0_i32_0 = arith.constant 0 : i32
    return %arg0, %c0_i32, %arg1 : i32, i32, i32
  }
}

module attributes {stable_mosaic.version = 11 : i64} {
  func.func @_convcat_cam_kernel(%arg0: i32, %arg1: memref<1x360x256xbf16, #tpu.memory_space<vmem>>, %arg2: memref<8x360xbf16, #tpu.memory_space<vmem>>, %arg3: memref<8x1xf32, #tpu.memory_space<vmem>>, %arg4: memref<1x1xf32, #tpu.memory_space<vmem>>, %arg5: memref<1x8x256xf32, #tpu.memory_space<vmem>>) attributes {dimension_semantics = [#tpu.dimension_semantics<parallel>], iteration_bounds = array<i64: 2>, scalar_prefetch = 0 : i64, scratch_operands = 0 : i64, tpu.core_type = #tpu.core_type<tc>, window_params = [{transform_indices = @transform_0, window_bounds = array<i64: 1, 360, 256>}, {pipeline_mode = #tpu.pipeline_mode<synchronous>, transform_indices = @transform_1, window_bounds = array<i64: 8, 360>}, {pipeline_mode = #tpu.pipeline_mode<synchronous>, transform_indices = @transform_2, window_bounds = array<i64: 8, 1>}, {pipeline_mode = #tpu.pipeline_mode<synchronous>, transform_indices = @transform_3, window_bounds = array<i64: 1, 1>}, {transform_indices = @transform_4, window_bounds = array<i64: 1, 8, 256>}]} {
    %c0 = arith.constant 0 : index
    %c0_0 = arith.constant 0 : index
    %0 = vector.load %arg2[%c0, %c0_0] : memref<8x360xbf16, #tpu.memory_space<vmem>>, vector<8x360xbf16>
    %c0_1 = arith.constant 0 : index
    %c0_2 = arith.constant 0 : index
    %c0_3 = arith.constant 0 : index
    %1 = vector.load %arg1[%c0_1, %c0_2, %c0_3] : memref<1x360x256xbf16, #tpu.memory_space<vmem>>, vector<1x360x256xbf16>
    %2 = vector.shape_cast %1 : vector<1x360x256xbf16> to vector<360x256xbf16>
    %cst = arith.constant dense<0.000000e+00> : vector<8x256xf32>
    %3 = tpu.matmul %0, %2, %cst {dimension_numbers = #tpu.dot_dimension_numbers<[1], [0], [0], [1], [0, 0, 1, 1], [], []>} : vector<8x360xbf16>, vector<360x256xbf16>, vector<8x256xf32> -> vector<8x256xf32>
    %c0_4 = arith.constant 0 : index
    %c0_5 = arith.constant 0 : index
    %4 = vector.load %arg3[%c0_4, %c0_5] : memref<8x1xf32, #tpu.memory_space<vmem>>, vector<8x1xf32>
    %5 = vector.broadcast %4 : vector<8x1xf32> to vector<8x256xf32>
    %6 = arith.addf %3, %5 : vector<8x256xf32>
    %7 = tpu.transpose %6, [1, 0] : vector<8x256xf32> -> vector<256x8xf32>
    %cst_6 = arith.constant dense<0.000000e+00> : vector<8x8xf32>
    %8 = tpu.matmul %6, %7, %cst_6 {dimension_numbers = #tpu.dot_dimension_numbers<[1], [0], [0], [1], [0, 0, 1, 1], [], []>} : vector<8x256xf32>, vector<256x8xf32>, vector<8x8xf32> -> vector<8x8xf32>
    %cst_7 = arith.constant dense<0xFF800000> : vector<8xf32>
    %9 = vector.multi_reduction <maximumf>, %8, %cst_7 [1] : vector<8x8xf32> to vector<8xf32>
    %10 = vector.shape_cast %9 : vector<8xf32> to vector<8x1xf32>
    %11 = vector.broadcast %10 : vector<8x1xf32> to vector<8x8xf32>
    %12 = arith.subf %11, %8 : vector<8x8xf32>
    %cst_8 = arith.constant dense<0xFF800000> : vector<8xf32>
    %13 = vector.multi_reduction <maximumf>, %12, %cst_8 [1] : vector<8x8xf32> to vector<8xf32>
    %14 = vector.shape_cast %13 : vector<8xf32> to vector<8x1xf32>
    %15 = vector.broadcast %14 : vector<8x1xf32> to vector<8x8xf32>
    %16 = arith.subf %12, %15 : vector<8x8xf32>
    %17 = math.exp %16 : vector<8x8xf32>
    %cst_9 = arith.constant dense<0.000000e+00> : vector<8xf32>
    %18 = vector.multi_reduction <add>, %17, %cst_9 [1] : vector<8x8xf32> to vector<8xf32>
    %19 = vector.shape_cast %18 : vector<8xf32> to vector<8x1xf32>
    %20 = vector.broadcast %19 : vector<8x1xf32> to vector<8x8xf32>
    %21 = arith.divf %17, %20 : vector<8x8xf32>
    %cst_10 = arith.constant dense<0.000000e+00> : vector<8x256xf32>
    %22 = tpu.matmul %21, %6, %cst_10 {dimension_numbers = #tpu.dot_dimension_numbers<[1], [0], [0], [1], [0, 0, 1, 1], [], []>} : vector<8x8xf32>, vector<8x256xf32>, vector<8x256xf32> -> vector<8x256xf32>
    %c0_11 = arith.constant 0 : index
    %c0_12 = arith.constant 0 : index
    %23 = vector.load %arg4[%c0_11, %c0_12] : memref<1x1xf32, #tpu.memory_space<vmem>>, vector<1x1xf32>
    %24 = vector.extract %23[0, 0] : f32 from vector<1x1xf32>
    %25 = vector.broadcast %24 : f32 to vector<8x256xf32>
    %26 = arith.mulf %25, %22 : vector<8x256xf32>
    %27 = arith.addf %26, %6 : vector<8x256xf32>
    %28 = vector.shape_cast %27 : vector<8x256xf32> to vector<1x8x256xf32>
    %c0_13 = arith.constant 0 : index
    %c0_14 = arith.constant 0 : index
    %c0_15 = arith.constant 0 : index
    %29 = vector.load %arg5[%c0_13, %c0_14, %c0_15] : memref<1x8x256xf32, #tpu.memory_space<vmem>>, vector<1x8x256xf32>
    tpu.vector_store %arg5[%c0_13, %c0_14, %c0_15], %28 {strides = array<i32>} : memref<1x8x256xf32, #tpu.memory_space<vmem>>, vector<1x8x256xf32>,
    return
  }
  func.func @transform_0(%arg0: i32) -> (i32, i32, i32) {
    %c0_i32 = arith.constant 0 : i32
    %c0_i32_0 = arith.constant 0 : i32
    %c0_i32_1 = arith.constant 0 : i32
    return %arg0, %c0_i32, %c0_i32_0 : i32, i32, i32
  }
  func.func @transform_1(%arg0: i32) -> (i32, i32) {
    %c0_i32 = arith.constant 0 : i32
    %c0_i32_0 = arith.constant 0 : i32
    %c0_i32_1 = arith.constant 0 : i32
    return %c0_i32, %c0_i32_0 : i32, i32
  }
  func.func @transform_2(%arg0: i32) -> (i32, i32) {
    %c0_i32 = arith.constant 0 : i32
    %c0_i32_0 = arith.constant 0 : i32
    %c0_i32_1 = arith.constant 0 : i32
    return %c0_i32, %c0_i32_0 : i32, i32
  }
  func.func @transform_3(%arg0: i32) -> (i32, i32) {
    %c0_i32 = arith.constant 0 : i32
    %c0_i32_0 = arith.constant 0 : i32
    %c0_i32_1 = arith.constant 0 : i32
    return %c0_i32, %c0_i32_0 : i32, i32
  }
  func.func @transform_4(%arg0: i32) -> (i32, i32, i32) {
    %c0_i32 = arith.constant 0 : i32
    %c0_i32_0 = arith.constant 0 : i32
    %c0_i32_1 = arith.constant 0 : i32
    return %arg0, %c0_i32, %c0_i32_0 : i32, i32, i32
  }
}

module attributes {stable_mosaic.version = 11 : i64} {
  func.func @_matmul_bias_kernel(%arg0: i32, %arg1: i32, %arg2: memref<1x72x256xbf16, #tpu.memory_space<vmem>>, %arg3: memref<8x72xbf16, #tpu.memory_space<vmem>>, %arg4: memref<8x1xf32, #tpu.memory_space<vmem>>, %arg5: memref<1x8x256xf32, #tpu.memory_space<vmem>>, %arg6: memref<1x8x256xf32, #tpu.memory_space<vmem>>) attributes {dimension_semantics = [#tpu.dimension_semantics<parallel>, #tpu.dimension_semantics<parallel>], iteration_bounds = array<i64: 2, 1>, scalar_prefetch = 0 : i64, scratch_operands = 0 : i64, tpu.core_type = #tpu.core_type<tc>, window_params = [{transform_indices = @transform_0, window_bounds = array<i64: 1, 72, 256>}, {pipeline_mode = #tpu.pipeline_mode<synchronous>, transform_indices = @transform_1, window_bounds = array<i64: 8, 72>}, {pipeline_mode = #tpu.pipeline_mode<synchronous>, transform_indices = @transform_2, window_bounds = array<i64: 8, 1>}, {transform_indices = @transform_3, window_bounds = array<i64: 1, 8, 256>}, {transform_indices = @transform_4, window_bounds = array<i64: 1, 8, 256>}]} {
    %c0 = arith.constant 0 : index
    %c0_0 = arith.constant 0 : index
    %0 = vector.load %arg3[%c0, %c0_0] : memref<8x72xbf16, #tpu.memory_space<vmem>>, vector<8x72xbf16>
    %c0_1 = arith.constant 0 : index
    %c0_2 = arith.constant 0 : index
    %c0_3 = arith.constant 0 : index
    %1 = vector.load %arg2[%c0_1, %c0_2, %c0_3] : memref<1x72x256xbf16, #tpu.memory_space<vmem>>, vector<1x72x256xbf16>
    %2 = vector.shape_cast %1 : vector<1x72x256xbf16> to vector<72x256xbf16>
    %cst = arith.constant dense<0.000000e+00> : vector<8x256xf32>
    %3 = tpu.matmul %0, %2, %cst {dimension_numbers = #tpu.dot_dimension_numbers<[1], [0], [0], [1], [0, 0, 1, 1], [], []>} : vector<8x72xbf16>, vector<72x256xbf16>, vector<8x256xf32> -> vector<8x256xf32>
    %c0_4 = arith.constant 0 : index
    %c0_5 = arith.constant 0 : index
    %4 = vector.load %arg4[%c0_4, %c0_5] : memref<8x1xf32, #tpu.memory_space<vmem>>, vector<8x1xf32>
    %5 = vector.broadcast %4 : vector<8x1xf32> to vector<8x256xf32>
    %6 = arith.addf %3, %5 : vector<8x256xf32>
    %c0_6 = arith.constant 0 : index
    %c0_7 = arith.constant 0 : index
    %c0_8 = arith.constant 0 : index
    %7 = vector.load %arg5[%c0_6, %c0_7, %c0_8] : memref<1x8x256xf32, #tpu.memory_space<vmem>>, vector<1x8x256xf32>
    %8 = vector.shape_cast %7 : vector<1x8x256xf32> to vector<8x256xf32>
    %9 = arith.addf %6, %8 : vector<8x256xf32>
    %cst_9 = arith.constant 0.000000e+00 : f32
    %10 = vector.broadcast %cst_9 : f32 to vector<8x256xf32>
    %11 = arith.maximumf %9, %10 : vector<8x256xf32>
    %12 = vector.shape_cast %11 : vector<8x256xf32> to vector<1x8x256xf32>
    %c0_10 = arith.constant 0 : index
    %c0_11 = arith.constant 0 : index
    %c0_12 = arith.constant 0 : index
    %13 = vector.load %arg6[%c0_10, %c0_11, %c0_12] : memref<1x8x256xf32, #tpu.memory_space<vmem>>, vector<1x8x256xf32>
    tpu.vector_store %arg6[%c0_10, %c0_11, %c0_12], %12 {strides = array<i32>} : memref<1x8x256xf32, #tpu.memory_space<vmem>>, vector<1x8x256xf32>,
    return
  }
  func.func @transform_0(%arg0: i32, %arg1: i32) -> (i32, i32, i32) {
    %c0_i32 = arith.constant 0 : i32
    %c0_i32_0 = arith.constant 0 : i32
    return %arg0, %c0_i32, %arg1 : i32, i32, i32
  }
  func.func @transform_1(%arg0: i32, %arg1: i32) -> (i32, i32) {
    %c0_i32 = arith.constant 0 : i32
    %c0_i32_0 = arith.constant 0 : i32
    %c0_i32_1 = arith.constant 0 : i32
    return %c0_i32, %c0_i32_0 : i32, i32
  }
  func.func @transform_2(%arg0: i32, %arg1: i32) -> (i32, i32) {
    %c0_i32 = arith.constant 0 : i32
    %c0_i32_0 = arith.constant 0 : i32
    %c0_i32_1 = arith.constant 0 : i32
    return %c0_i32, %c0_i32_0 : i32, i32
  }
  func.func @transform_3(%arg0: i32, %arg1: i32) -> (i32, i32, i32) {
    %c5_i32 = arith.constant 5 : i32
    %c0_i32 = arith.constant 0 : i32
    return %arg0, %c5_i32, %arg1 : i32, i32, i32
  }
  func.func @transform_4(%arg0: i32, %arg1: i32) -> (i32, i32, i32) {
    %c0_i32 = arith.constant 0 : i32
    %c0_i32_0 = arith.constant 0 : i32
    return %arg0, %c0_i32, %arg1 : i32, i32, i32
  }
}

</mosaic_0001>

<bundles_post_ra>
// kernel: ham_forward.15
= control target key start
LH: loop header
LB: loop body
LE: loop exit
PB: predicated region body
PF: predicated region fallthrough
CT: control target
= control target key end

     0   :  { %s552_s12 = smov 0   ;;  %s554_s13 = smov 0   ;;  %s630_s0 = inlined_call_operand.vmem [shape: bf16[2,16,256], index: 0, kind: input, shape index: {}]   ;;  %s631_s1 = inlined_call_operand.vmem [shape: bf16[48,16], index: 1, kind: input, shape index: {}]   ;;  %s632_s2 = inlined_call_operand.vmem [shape: f32[48,1], index: 2, kind: input, shape index: {}]   ;;  %s633_s3 = inlined_call_operand.vmem [shape: f32[2,48,256], index: 3, kind: output, shape index: {}]  }
   0x1   :  { %s556_s14 = smov 0  }
   0x2 LB: > { %s25_s15 = sadd.s32 1, %s525_s13  ;;  %p456_p0 = scmp.ge.s32.totalorder %s529_s14, 1  ;;  %s529_s14 = sphi %s556_s14, %s13_s14   ;;  %s525_s13 = sphi %s554_s13, %s635_s13   ;;  %s521_s12 = sphi %s552_s12, %s634_s12  }
   0x3   : > { %p27_p1 = scmp.ge.s32.totalorder %s25_s15, 2  ;;  %p158_p2 = scmp.lt.s32.totalorder %s529_s14, 3 }
   0x5   : > { %s637_s15 = smov (%p27_p1, %s25_s15), 0  ;;  %p159_p3 = pnand %p456_p0, %p158_p2 }
   0x6   : > { %p191_p4 = scmp.lt.s32.totalorder (!%p159_p3), %s521_s12, 1  ;;  %v531_v0 = vmov (!%p159_p3), 0   ;;  %v221_v1 = vld [vmem:[%s632_s2 + $0x10] sm:$0xff] (!%p159_p3)  ;;  %v219_v2 = vld [vmem:[%s632_s2] sm:$0xff] (!%p159_p3)  ;;  %v222_v5 = vld [vmem:[%s632_s2 + $0x18] sm:$0xff] (!%p159_p3)  ;;  %vm280_vm0 = vcmask (!%p159_p3), 130048  }
   0x7   : > { %162 = sbr.rel (%p159_p3) target bundleno = 248 (0xf8), region = 32  ;;  %322 = vmatprep.mubr.bf16.mxu0 (!%p159_p3), %v531_v0  ;;  %332 = vmatprep.mubr.bf16.mxu1 (!%p159_p3), %v531_v0  ;;  %v220_v6 = vld [vmem:[%s632_s2 + $0x8] sm:$0xff] (!%p159_p3)  ;;  %v504_v7 = vld [vmem:[%s631_s1] sm:$0xff] (!%p159_p3)   ;;  %v506_v11 = vld [vmem:[%s631_s1 + $0x10] sm:$0xff] (!%p159_p3)  }
   0x8   : > { %500 = vset.pattern.permute.xlu1 (!%p159_p3), %v531_v0  ;;  %499 = vset.pattern.permute.xlu0 (!%p159_p3), %v531_v0  ;;  %v505_v8 = vld [vmem:[%s631_s1 + $0x8] sm:$0xff] (!%p159_p3)   ;;  %v223_v10 = vld [vmem:[%s632_s2 + $0x20] sm:$0xff] (!%p159_p3) }
   0x9   : > { %237 = vperm.xlu1 (!%p159_p3), %500, %v221_v1   ;;  %227 = vperm.xlu0 (!%p159_p3), %499, %v219_v2   ;;  %v224_v9 = vld [vmem:[%s632_s2 + $0x28] sm:$0xff] (!%p159_p3) }
   0xd   : > { %242 = vperm.xlu1 (!%p159_p3), %500, %v222_v5   ;;  %232 = vperm.xlu0 (!%p159_p3), %499, %v220_v6  }
   0xe   : > { %s639_s12 = smov (!%p191_p4, %s521_s12), 1 }
   0xf   : > { %s470_s20 = sshll.u32 %s639_s12, 4  ;;  %s473_s11 = smul.u32 96, %s639_s12 }
  0x10   : > { %s198_s23 = scalar_lea.vmem %s630_s0, %s470_s20 }
  0x11   : > { %v501_v3 = vld [vmem:[%s198_s23 + $0x4] ss:$8 sps:$4 sm:$0xff]   ;;  %v503_v4 = vld [vmem:[%s198_s23] ss:$8 sps:$4 sm:$0xff]   ;;  %252 = vperm.xlu1 %500, %v224_v9   ;;  %247 = vperm.xlu0 %499, %v223_v10   ;;  %s607_s18 = scalar_lea.vmem %s633_s3, %s473_s11 }
  0x12   : > { %290 = vmatprep.subr.bf16.mxu0 %v501_v3  ;;  %471 = vmatprep.subr.bf16.mxu1 %v501_v3 }
  0x13   : > { %291 = vmatpush1.bf16.msra.mxu0 %v503_v4  ;;  %472 = vmatpush1.bf16.msra.mxu1 %v503_v4 }
  0x16   : > { %465 = vmatmul.mubr.msk.bf16.vlgmr.msra.gmra.mrb[0].mxu0 %vm280_vm0, %v504_v7  ;;  %466 = vmatmul.mubr.msk.bf16.vlgmr.msra.gmra.mrb[0].mxu1 %vm280_vm0, %v505_v8 }
  0x17   : > { %342 = vmatprep.mubr.bf16.mxu1 %v531_v0 }
  0x1e   : > { %467 = vmatmul.mubr.msk.bf16.gmra.mrb[4].mxu1 %vm280_vm0, %v506_v11 }
  0x88   : > { %v238_v12 = vpop.permute.xlu1 %237  ;;  %v228_v13 = vpop.permute.xlu0 %227 }
  0x8c   : > { %v243_v14 = vpop.permute.xlu1 %242  ;;  %v233_v15 = vpop.permute.xlu0 %232 }
  0x90   : > { %v248_v32 = vpop.permute.xlu0 %247  ;;  %v253_v36 = vpop.permute.xlu1 %252 }
  0xe9   : > { %v324_v16 = vpop.f32.mrb[0].mxu0  ;;  %v334_v17 = vpop.f32.mrb[0].mxu1 }
  0xea   : > { %v325_v18 = vadd.f32 %v324_v16, %v228_v13  ;;  %v335_v19 = vadd.f32 %v334_v17, %v238_v12  ;;  %v326_v20 = vpop.f32.mrb[1].mxu0  ;;  %v336_v21 = vpop.f32.mrb[1].mxu1 }
  0xeb   : > { %v327_v22 = vadd.f32 %v326_v20, %v228_v13  ;;  %v337_v23 = vadd.f32 %v336_v21, %v238_v12  ;;  %v328_v24 = vpop.f32.mrb[2].mxu0  ;;  %v338_v25 = vpop.f32.mrb[2].mxu1 }
  0xec   : > { %353 = vst [vmem:[%s607_s18] sm:$0xff] %v325_v18  ;;  %357 = vst [vmem:[%s607_s18 + $0x20] sm:$0xff] %v335_v19  ;;  %v329_v26 = vadd.f32 %v328_v24, %v233_v15  ;;  %v339_v27 = vadd.f32 %v338_v25, %v243_v14  ;;  %v330_v28 = vpop.f32.mrb[3].mxu0  ;;  %v340_v29 = vpop.f32.mrb[3].mxu1 }
  0xed   : > { %354 = vst [vmem:[%s607_s18 + $0x8] sm:$0xff] %v327_v22  ;;  %358 = vst [vmem:[%s607_s18 + $0x28] sm:$0xff] %v337_v23  ;;  %v331_v30 = vadd.f32 %v330_v28, %v233_v15  ;;  %v341_v31 = vadd.f32 %v340_v29, %v243_v14 }
  0xee   : > { %355 = vst [vmem:[%s607_s18 + $0x10] sm:$0xff] %v329_v26  ;;  %359 = vst [vmem:[%s607_s18 + $0x30] sm:$0xff] %v339_v27 }
  0xef   : > { %356 = vst [vmem:[%s607_s18 + $0x18] sm:$0xff] %v331_v30  ;;  %360 = vst [vmem:[%s607_s18 + $0x38] sm:$0xff] %v341_v31 }
  0xf1   : > { %v344_v33 = vpop.f32.mrb[4].mxu1 }
  0xf2   : > { %v345_v34 = vadd.f32 %v344_v33, %v248_v32  ;;  %v346_v35 = vpop.f32.mrb[5].mxu1 }
  0xf3   : > { %v347_v37 = vadd.f32 %v346_v35, %v248_v32  ;;  %v348_v38 = vpop.f32.mrb[6].mxu1 }
  0xf4   : > { %361 = vst [vmem:[%s607_s18 + $0x40] sm:$0xff] %v345_v34  ;;  %v349_v39 = vadd.f32 %v348_v38, %v253_v36  ;;  %v350_v40 = vpop.f32.mrb[7].mxu1 }
  0xf5   : > { %362 = vst [vmem:[%s607_s18 + $0x48] sm:$0xff] %v347_v37  ;;  %v351_v41 = vadd.f32 %v350_v40, %v253_v36 }
  0xf6   : > { %363 = vst [vmem:[%s607_s18 + $0x50] sm:$0xff] %v349_v39 }
  0xf7   : > { %364 = vst [vmem:[%s607_s18 + $0x58] sm:$0xff] %v351_v41 }
  0xf8 PF: > { %s13_s14 = sadd.s32 1, %s529_s14   ;;  %s634_s12 = smov %s525_s13 }
  0xf9   : > { %p10_p5 = scmp.ge.s32.totalorder %s13_s14, 4   ;;  %s635_s13 = smov %s637_s15 }
  0xfb   :  { %12 = sbr.rel (!%p10_p5) target bundleno = 2 (0x2), region = 62 }

// kernel: ham_forward.25
= control target key start
LH: loop header
LB: loop body
LE: loop exit
PB: predicated region body
PF: predicated region fallthrough
CT: control target
= control target key end

     0   :  { %s522_s12 = smov 0   ;;  %s524_s13 = smov 0   ;;  %s565_s0 = inlined_call_operand.vmem [shape: bf16[2,72,256], index: 0, kind: input, shape index: {}]   ;;  %s566_s1 = inlined_call_operand.vmem [shape: bf16[8,72], index: 1, kind: input, shape index: {}]   ;;  %s567_s2 = inlined_call_operand.vmem [shape: f32[8,1], index: 2, kind: input, shape index: {}]   ;;  %s568_s3 = inlined_call_operand.vmem [shape: f32[2,8,256], index: 3, kind: output, shape index: {}]  }
   0x1   :  { %s526_s14 = smov 0  }
   0x2 LB: > { %s25_s15 = sadd.s32 1, %s495_s13  ;;  %p417_p0 = scmp.ge.s32.totalorder %s499_s14, 1  ;;  %s499_s14 = sphi %s526_s14, %s13_s14   ;;  %s495_s13 = sphi %s524_s13, %s570_s13   ;;  %s491_s12 = sphi %s522_s12, %s569_s12  }
   0x3   : > { %p27_p1 = scmp.ge.s32.totalorder %s25_s15, 2  ;;  %p158_p2 = scmp.lt.s32.totalorder %s499_s14, 3 }
   0x5   : > { %s572_s15 = smov (%p27_p1, %s25_s15), 0  ;;  %p159_p3 = pnand %p417_p0, %p158_p2 }
   0x6   : > { %p191_p4 = scmp.lt.s32.totalorder (!%p159_p3), %s491_s12, 1  ;;  %v501_v0 = vmov (!%p159_p3), 0   ;;  %v221_v1 = vld [vmem:[%s567_s2] sm:$0xff] (!%p159_p3)  ;;  %vm276_vm0 = vcmask (!%p159_p3), 1043456   ;;  %vm272_vm1 = vcmask (!%p159_p3), 588800  }
   0x7   : > { %162 = sbr.rel (%p159_p3) target bundleno = 255 (0xff), region = 32  ;;  %315 = vmatprep.mubr.bf16.mxu0 (!%p159_p3), %v501_v0  ;;  %462 = vset.pattern.permute.xlu0 (!%p159_p3), %v501_v0  ;;  %v211_v14 = vld [vmem:[%s566_s1] sm:$0xf] (!%p159_p3) }
   0x8   : > { %224 = vperm.xlu0 (!%p159_p3), %462, %v221_v1  }
   0xe   : > { %s574_s12 = smov (!%p191_p4, %s491_s12), 1 }
   0xf   : > { %s436_s18 = smul.u32 72, %s574_s12  ;;  %s435_s24 = sshll.u32 %s574_s12, 4 }
  0x10   : > { %s208_s27 = scalar_lea.vmem %s568_s3, %s435_s24 }
  0x11   : > { %s198_s21 = scalar_lea.vmem %s565_s0, %s436_s18 }
  0x12   : > { %v463_v2 = vld [vmem:[%s198_s21 + $0x4] ss:$8 sps:$4 sm:$0xff]   ;;  %v465_v3 = vld [vmem:[%s198_s21] ss:$8 sps:$4 sm:$0xff]   ;;  %v466_v4 = vld [vmem:[%s198_s21 + $0x14] ss:$8 sps:$4 sm:$0xff]  }
  0x13   : > { %283 = vmatprep.subr.bf16.mxu0 %v463_v2  ;;  %v468_v5 = vld [vmem:[%s198_s21 + $0x10] ss:$8 sps:$4 sm:$0xff]   ;;  %v469_v6 = vld [vmem:[%s198_s21 + $0x24] ss:$8 sps:$4 sm:$0xff]   ;;  %v471_v7 = vld [vmem:[%s198_s21 + $0x20] ss:$8 sps:$4 sm:$0xff]  }
  0x14   : > { %284 = vmatpush1.bf16.msra.mxu0 %v465_v3  ;;  %v472_v8 = vld [vmem:[%s198_s21 + $0x34] ss:$8 sps:$4 sm:$0xff]   ;;  %v220_v9 = vld [vmem:[%s198_s21 + $0x40] sm:$0xff]  ;;  %v474_v10 = vld [vmem:[%s198_s21 + $0x30] ss:$8 sps:$4 sm:$0xff]  }
  0x15   : > { %285 = vmatprep.subr.bf16.mxu0 %v466_v4  ;;  %v430_v11 = vcombine.high %v220_v9, %v220_v9  ;;  %v429_v12 = vcombine.low %v220_v9, %v220_v9 }
  0x17   : > { %v278_v13 = vsel %vm276_vm0, %v429_v12, 0 }
  0x18   : > { %286 = vmatpush1.bf16.msra.mxu0 %v468_v5 }
  0x19   : > { %287 = vmatprep.subr.bf16.mxu0 %v469_v6 }
  0x1c   : > { %288 = vmatpush1.bf16.msra.mxu0 %v471_v7 }
  0x1d   : > { %289 = vmatprep.subr.bf16.mxu0 %v472_v8 }
  0x20   : > { %290 = vmatpush1.bf16.msra.mxu0 %v474_v10 }
  0x21   : > { %431 = vmatprep.subr.msk.bf16.mxu0 %vm276_vm0, %v430_v11 }
  0x24   : > { %292 = vmatpush1.bf16.msra.mxu0 %v278_v13 }
  0x27   : > { %432 = vmatmul.mubr.msk.bf16.vlgmr.msra.gmra.mrb[0].mxu0 %vm272_vm1, %v211_v14 }
  0x87   : > { %v225_v15 = vpop.permute.xlu0 %224 }
  0xfa   : > { %v317_v16 = vpop.f32.mrb[0].mxu0 }
  0xfb   : > { %v318_v17 = vadd.f32 %v317_v16, %v225_v15  ;;  %v319_v18 = vpop.f32.mrb[1].mxu0 }
  0xfc   : > { %v320_v19 = vadd.f32 %v319_v18, %v225_v15  ;;  %v321_v20 = vpop.f32.mrb[2].mxu0 }
  0xfd   : > { %324 = vst [vmem:[%s208_s27] sm:$0xff] %v318_v17  ;;  %v322_v21 = vpop.f32.mrb[3].mxu0 }
  0xfe   : > { %325 = vst [vmem:[%s208_s27 + $0x8] sm:$0xff] %v320_v19 }
  0xff PF: > { %s13_s14 = sadd.s32 1, %s499_s14   ;;  %s569_s12 = smov %s495_s13 }
 0x100   : > { %p10_p5 = scmp.ge.s32.totalorder %s13_s14, 4   ;;  %s570_s13 = smov %s572_s15 }
 0x102   :  { %12 = sbr.rel (!%p10_p5) target bundleno = 2 (0x2), region = 62 }

// kernel: ham_forward.22
= control target key start
LH: loop header
LB: loop body
LE: loop exit
PB: predicated region body
PF: predicated region fallthrough
CT: control target
= control target key end

     0   :  { %s505_s12 = smov 0   ;;  %s507_s13 = smov 0   ;;  %s548_s0 = inlined_call_operand.vmem [shape: bf16[2,56,256], index: 0, kind: input, shape index: {}]   ;;  %s549_s1 = inlined_call_operand.vmem [shape: bf16[8,56], index: 1, kind: input, shape index: {}]   ;;  %s550_s2 = inlined_call_operand.vmem [shape: f32[8,1], index: 2, kind: input, shape index: {}]   ;;  %s551_s3 = inlined_call_operand.vmem [shape: f32[2,8,256], index: 3, kind: output, shape index: {}]  }
   0x1   :  { %s509_s14 = smov 0  }
   0x2 LB: > { %s25_s15 = sadd.s32 1, %s478_s13  ;;  %p405_p0 = scmp.ge.s32.totalorder %s482_s14, 1  ;;  %s482_s14 = sphi %s509_s14, %s13_s14   ;;  %s478_s13 = sphi %s507_s13, %s553_s13   ;;  %s474_s12 = sphi %s505_s12, %s552_s12  }
   0x3   : > { %p27_p1 = scmp.ge.s32.totalorder %s25_s15, 2  ;;  %p158_p2 = scmp.lt.s32.totalorder %s482_s14, 3 }
   0x5   : > { %s555_s15 = smov (%p27_p1, %s25_s15), 0  ;;  %p159_p3 = pnand %p405_p0, %p158_p2 }
   0x6   : > { %p191_p4 = scmp.lt.s32.totalorder (!%p159_p3), %s474_s12, 1  ;;  %v484_v0 = vmov (!%p159_p3), 0   ;;  %v219_v1 = vld [vmem:[%s550_s2] sm:$0xff] (!%p159_p3)  ;;  %vm264_vm0 = vcmask (!%p159_p3), 1043456   ;;  %vm260_vm1 = vcmask (!%p159_p3), 457728  }
   0x7   : > { %162 = sbr.rel (%p159_p3) target bundleno = 251 (0xfb), region = 32  ;;  %303 = vmatprep.mubr.bf16.mxu0 (!%p159_p3), %v484_v0  ;;  %448 = vset.pattern.permute.xlu0 (!%p159_p3), %v484_v0  ;;  %v211_v12 = vld [vmem:[%s549_s1] sm:$0xf] (!%p159_p3) }
   0x8   : > { %222 = vperm.xlu0 (!%p159_p3), %448, %v219_v1  }
   0xe   : > { %s557_s12 = smov (!%p191_p4, %s474_s12), 1 }
   0xf   : > { %s422_s18 = smul.u32 56, %s557_s12  ;;  %s421_s24 = sshll.u32 %s557_s12, 4 }
  0x10   : > { %s208_s27 = scalar_lea.vmem %s551_s3, %s421_s24 }
  0x11   : > { %s198_s21 = scalar_lea.vmem %s548_s0, %s422_s18 }
  0x12   : > { %v449_v2 = vld [vmem:[%s198_s21 + $0x4] ss:$8 sps:$4 sm:$0xff]   ;;  %v451_v3 = vld [vmem:[%s198_s21] ss:$8 sps:$4 sm:$0xff]   ;;  %v452_v4 = vld [vmem:[%s198_s21 + $0x14] ss:$8 sps:$4 sm:$0xff]  }
  0x13   : > { %271 = vmatprep.subr.bf16.mxu0 %v449_v2  ;;  %v454_v5 = vld [vmem:[%s198_s21 + $0x10] ss:$8 sps:$4 sm:$0xff]   ;;  %v455_v6 = vld [vmem:[%s198_s21 + $0x24] ss:$8 sps:$4 sm:$0xff]   ;;  %v457_v8 = vld [vmem:[%s198_s21 + $0x20] ss:$8 sps:$4 sm:$0xff]  }
  0x14   : > { %272 = vmatpush1.bf16.msra.mxu0 %v451_v3  ;;  %v218_v7 = vld [vmem:[%s198_s21 + $0x30] sm:$0xff] }
  0x15   : > { %273 = vmatprep.subr.bf16.mxu0 %v452_v4  ;;  %v416_v9 = vcombine.high %v218_v7, %v218_v7  ;;  %v415_v10 = vcombine.low %v218_v7, %v218_v7 }
  0x17   : > { %v266_v11 = vsel %vm264_vm0, %v415_v10, 0 }
  0x18   : > { %274 = vmatpush1.bf16.msra.mxu0 %v454_v5 }
  0x19   : > { %275 = vmatprep.subr.bf16.mxu0 %v455_v6 }
  0x1c   : > { %276 = vmatpush1.bf16.msra.mxu0 %v457_v8 }
  0x1d   : > { %417 = vmatprep.subr.msk.bf16.mxu0 %vm264_vm0, %v416_v9 }
  0x20   : > { %278 = vmatpush1.bf16.msra.mxu0 %v266_v11 }
  0x23   : > { %418 = vmatmul.mubr.msk.bf16.vlgmr.msra.gmra.mrb[0].mxu0 %vm260_vm1, %v211_v12 }
  0x87   : > { %v223_v13 = vpop.permute.xlu0 %222 }
  0xf6   : > { %v305_v14 = vpop.f32.mrb[0].mxu0 }
  0xf7   : > { %v306_v15 = vadd.f32 %v305_v14, %v223_v13  ;;  %v307_v16 = vpop.f32.mrb[1].mxu0 }
  0xf8   : > { %v308_v17 = vadd.f32 %v307_v16, %v223_v13  ;;  %v309_v18 = vpop.f32.mrb[2].mxu0 }
  0xf9   : > { %312 = vst [vmem:[%s208_s27] sm:$0xff] %v306_v15  ;;  %v310_v19 = vpop.f32.mrb[3].mxu0 }
  0xfa   : > { %313 = vst [vmem:[%s208_s27 + $0x8] sm:$0xff] %v308_v17 }
  0xfb PF: > { %s13_s14 = sadd.s32 1, %s482_s14   ;;  %s552_s12 = smov %s478_s13 }
  0xfc   : > { %p10_p5 = scmp.ge.s32.totalorder %s13_s14, 4   ;;  %s553_s13 = smov %s555_s15 }
  0xfe   :  { %12 = sbr.rel (!%p10_p5) target bundleno = 2 (0x2), region = 62 }

// kernel: ham_forward.19
= control target key start
LH: loop header
LB: loop body
LE: loop exit
PB: predicated region body
PF: predicated region fallthrough
CT: control target
= control target key end

     0   :  { %s488_s12 = smov 0   ;;  %s490_s13 = smov 0   ;;  %s527_s0 = inlined_call_operand.vmem [shape: bf16[2,40,256], index: 0, kind: input, shape index: {}]   ;;  %s528_s1 = inlined_call_operand.vmem [shape: bf16[8,40], index: 1, kind: input, shape index: {}]   ;;  %s529_s2 = inlined_call_operand.vmem [shape: f32[8,1], index: 2, kind: input, shape index: {}]   ;;  %s530_s3 = inlined_call_operand.vmem [shape: f32[2,8,256], index: 3, kind: output, shape index: {}]  }
   0x1   :  { %s492_s14 = smov 0  }
   0x2 LB: > { %s25_s15 = sadd.s32 1, %s461_s13  ;;  %p393_p0 = scmp.ge.s32.totalorder %s465_s14, 1  ;;  %s465_s14 = sphi %s492_s14, %s13_s14   ;;  %s461_s13 = sphi %s490_s13, %s532_s13   ;;  %s457_s12 = sphi %s488_s12, %s531_s12  }
   0x3   : > { %p27_p1 = scmp.ge.s32.totalorder %s25_s15, 2  ;;  %p158_p2 = scmp.lt.s32.totalorder %s465_s14, 3 }
   0x5   : > { %s534_s15 = smov (%p27_p1, %s25_s15), 0  ;;  %p159_p3 = pnand %p393_p0, %p158_p2 }
   0x6   : > { %p191_p4 = scmp.lt.s32.totalorder (!%p159_p3), %s457_s12, 1  ;;  %v467_v0 = vmov (!%p159_p3), 0   ;;  %v217_v1 = vld [vmem:[%s529_s2] sm:$0xff] (!%p159_p3)  ;;  %vm252_vm0 = vcmask (!%p159_p3), 1043456   ;;  %vm248_vm1 = vcmask (!%p159_p3), 326656  }
   0x7   : > { %162 = sbr.rel (%p159_p3) target bundleno = 247 (0xf7), region = 32  ;;  %291 = vmatprep.mubr.bf16.mxu0 (!%p159_p3), %v467_v0  ;;  %434 = vset.pattern.permute.xlu0 (!%p159_p3), %v467_v0  ;;  %v211_v10 = vld [vmem:[%s528_s1] sm:$0xf] (!%p159_p3) }
   0x8   : > { %220 = vperm.xlu0 (!%p159_p3), %434, %v217_v1  }
   0xe   : > { %s536_s12 = smov (!%p191_p4, %s457_s12), 1 }
   0xf   : > { %s408_s18 = smul.u32 40, %s536_s12  ;;  %s407_s24 = sshll.u32 %s536_s12, 4 }
  0x10   : > { %s208_s27 = scalar_lea.vmem %s530_s3, %s407_s24 }
  0x11   : > { %s198_s21 = scalar_lea.vmem %s527_s0, %s408_s18 }
  0x12   : > { %v435_v2 = vld [vmem:[%s198_s21 + $0x4] ss:$8 sps:$4 sm:$0xff]   ;;  %v437_v3 = vld [vmem:[%s198_s21] ss:$8 sps:$4 sm:$0xff]   ;;  %v438_v4 = vld [vmem:[%s198_s21 + $0x14] ss:$8 sps:$4 sm:$0xff]  }
  0x13   : > { %259 = vmatprep.subr.bf16.mxu0 %v435_v2  ;;  %v216_v5 = vld [vmem:[%s198_s21 + $0x20] sm:$0xff]  ;;  %v440_v6 = vld [vmem:[%s198_s21 + $0x10] ss:$8 sps:$4 sm:$0xff]  }
  0x14   : > { %260 = vmatpush1.bf16.msra.mxu0 %v437_v3  ;;  %v402_v7 = vcombine.high %v216_v5, %v216_v5  ;;  %v401_v8 = vcombine.low %v216_v5, %v216_v5 }
  0x15   : > { %261 = vmatprep.subr.bf16.mxu0 %v438_v4 }
  0x16   : > { %v254_v9 = vsel %vm252_vm0, %v401_v8, 0 }
  0x18   : > { %262 = vmatpush1.bf16.msra.mxu0 %v440_v6 }
  0x19   : > { %403 = vmatprep.subr.msk.bf16.mxu0 %vm252_vm0, %v402_v7 }
  0x1c   : > { %264 = vmatpush1.bf16.msra.mxu0 %v254_v9 }
  0x1f   : > { %404 = vmatmul.mubr.msk.bf16.vlgmr.msra.gmra.mrb[0].mxu0 %vm248_vm1, %v211_v10 }
  0x87   : > { %v221_v11 = vpop.permute.xlu0 %220 }
  0xf2   : > { %v293_v12 = vpop.f32.mrb[0].mxu0 }
  0xf3   : > { %v294_v13 = vadd.f32 %v293_v12, %v221_v11  ;;  %v295_v14 = vpop.f32.mrb[1].mxu0 }
  0xf4   : > { %v296_v15 = vadd.f32 %v295_v14, %v221_v11  ;;  %v297_v16 = vpop.f32.mrb[2].mxu0 }
  0xf5   : > { %300 = vst [vmem:[%s208_s27] sm:$0xff] %v294_v13  ;;  %v298_v17 = vpop.f32.mrb[3].mxu0 }
  0xf6   : > { %301 = vst [vmem:[%s208_s27 + $0x8] sm:$0xff] %v296_v15 }
  0xf7 PF: > { %s13_s14 = sadd.s32 1, %s465_s14   ;;  %s531_s12 = smov %s461_s13 }
  0xf8   : > { %p10_p5 = scmp.ge.s32.totalorder %s13_s14, 4   ;;  %s532_s13 = smov %s534_s15 }
  0xfa   :  { %12 = sbr.rel (!%p10_p5) target bundleno = 2 (0x2), region = 62 }

// kernel: ham_forward.16
= control target key start
LH: loop header
LB: loop body
LE: loop exit
PB: predicated region body
PF: predicated region fallthrough
CT: control target
= control target key end

     0   :  { %s471_s12 = smov 0   ;;  %s473_s13 = smov 0   ;;  %s510_s0 = inlined_call_operand.vmem [shape: bf16[2,24,256], index: 0, kind: input, shape index: {}]   ;;  %s511_s1 = inlined_call_operand.vmem [shape: bf16[8,24], index: 1, kind: input, shape index: {}]   ;;  %s512_s2 = inlined_call_operand.vmem [shape: f32[8,1], index: 2, kind: input, shape index: {}]   ;;  %s513_s3 = inlined_call_operand.vmem [shape: f32[2,8,256], index: 3, kind: output, shape index: {}]  }
   0x1   :  { %s475_s14 = smov 0  }
   0x2 LB: > { %s25_s15 = sadd.s32 1, %s444_s13  ;;  %p381_p0 = scmp.ge.s32.totalorder %s448_s14, 1  ;;  %s448_s14 = sphi %s475_s14, %s13_s14   ;;  %s444_s13 = sphi %s473_s13, %s515_s13   ;;  %s440_s12 = sphi %s471_s12, %s514_s12  }
   0x3   : > { %p27_p1 = scmp.ge.s32.totalorder %s25_s15, 2  ;;  %p158_p2 = scmp.lt.s32.totalorder %s448_s14, 3 }
   0x5   : > { %s517_s15 = smov (%p27_p1, %s25_s15), 0  ;;  %p159_p3 = pnand %p381_p0, %p158_p2 }
   0x6   : > { %p191_p4 = scmp.lt.s32.totalorder (!%p159_p3), %s440_s12, 1  ;;  %v450_v0 = vmov (!%p159_p3), 0   ;;  %v215_v1 = vld [vmem:[%s512_s2] sm:$0xff] (!%p159_p3)  ;;  %vm240_vm0 = vcmask (!%p159_p3), 1043456   ;;  %vm236_vm1 = vcmask (!%p159_p3), 195584  }
   0x7   : > { %162 = sbr.rel (%p159_p3) target bundleno = 243 (0xf3), region = 32  ;;  %279 = vmatprep.mubr.bf16.mxu0 (!%p159_p3), %v450_v0  ;;  %420 = vset.pattern.permute.xlu0 (!%p159_p3), %v450_v0  ;;  %v211_v8 = vld [vmem:[%s511_s1] sm:$0xf] (!%p159_p3) }
   0x8   : > { %218 = vperm.xlu0 (!%p159_p3), %420, %v215_v1  }
   0xe   : > { %s519_s12 = smov (!%p191_p4, %s440_s12), 1 }
   0xf   : > { %s394_s18 = smul.u32 24, %s519_s12  ;;  %s393_s24 = sshll.u32 %s519_s12, 4 }
  0x10   : > { %s208_s27 = scalar_lea.vmem %s513_s3, %s393_s24 }
  0x11   : > { %s198_s21 = scalar_lea.vmem %s510_s0, %s394_s18 }
  0x12   : > { %v214_v2 = vld [vmem:[%s198_s21 + $0x10] sm:$0xff]  ;;  %v421_v3 = vld [vmem:[%s198_s21 + $0x4] ss:$8 sps:$4 sm:$0xff]   ;;  %v424_v5 = vld [vmem:[%s198_s21] ss:$8 sps:$4 sm:$0xff]  }
  0x13   : > { %v388_v4 = vcombine.high %v214_v2, %v214_v2  ;;  %v387_v6 = vcombine.low %v214_v2, %v214_v2  ;;  %247 = vmatprep.subr.bf16.mxu0 %v421_v3 }
  0x14   : > { %248 = vmatpush1.bf16.msra.mxu0 %v424_v5 }
  0x15   : > { %389 = vmatprep.subr.msk.bf16.mxu0 %vm240_vm0, %v388_v4  ;;  %v242_v7 = vsel %vm240_vm0, %v387_v6, 0 }
  0x18   : > { %250 = vmatpush1.bf16.msra.mxu0 %v242_v7 }
  0x1b   : > { %390 = vmatmul.mubr.msk.bf16.vlgmr.msra.gmra.mrb[0].mxu0 %vm236_vm1, %v211_v8 }
  0x87   : > { %v219_v9 = vpop.permute.xlu0 %218 }
  0xee   : > { %v281_v10 = vpop.f32.mrb[0].mxu0 }
  0xef   : > { %v282_v11 = vadd.f32 %v281_v10, %v219_v9  ;;  %v283_v12 = vpop.f32.mrb[1].mxu0 }
  0xf0   : > { %v284_v13 = vadd.f32 %v283_v12, %v219_v9  ;;  %v285_v14 = vpop.f32.mrb[2].mxu0 }
  0xf1   : > { %288 = vst [vmem:[%s208_s27] sm:$0xff] %v282_v11  ;;  %v286_v15 = vpop.f32.mrb[3].mxu0 }
  0xf2   : > { %289 = vst [vmem:[%s208_s27 + $0x8] sm:$0xff] %v284_v13 }
  0xf3 PF: > { %s13_s14 = sadd.s32 1, %s448_s14   ;;  %s514_s12 = smov %s444_s13 }
  0xf4   : > { %p10_p5 = scmp.ge.s32.totalorder %s13_s14, 4   ;;  %s515_s13 = smov %s517_s15 }
  0xf6   :  { %12 = sbr.rel (!%p10_p5) target bundleno = 2 (0x2), region = 62 }

// kernel: ham_forward.29
= control target key start
LH: loop header
LB: loop body
LE: loop exit
PB: predicated region body
PF: predicated region fallthrough
CT: control target
= control target key end

     0   :  { %s623_s15 = smov 0   ;;  %s625_s16 = smov 0   ;;  %s670_s0 = inlined_call_operand.vmem [shape: bf16[2,72,256], index: 0, kind: input, shape index: {}]   ;;  %s671_s1 = inlined_call_operand.vmem [shape: bf16[8,72], index: 1, kind: input, shape index: {}]   ;;  %s672_s2 = inlined_call_operand.vmem [shape: f32[8,1], index: 2, kind: input, shape index: {}]   ;;  %s673_s3 = inlined_call_operand.vmem [shape: f32[2,48,256], index: 3, kind: input, shape index: {}]   ;;  %s674_s4 = inlined_call_operand.vmem [shape: f32[2,8,256], index: 4, kind: output, shape index: {}]  }
   0x1   :  { %s627_s17 = smov 0  }
   0x2 LB: > { %s26_s18 = sadd.s32 1, %s591_s16  ;;  %p510_p0 = scmp.ge.s32.totalorder %s595_s17, 1  ;;  %s595_s17 = sphi %s627_s17, %s14_s17   ;;  %s591_s16 = sphi %s625_s16, %s676_s16   ;;  %s587_s15 = sphi %s623_s15, %s675_s15  }
   0x3   : > { %p28_p1 = scmp.ge.s32.totalorder %s26_s18, 2  ;;  %p201_p2 = scmp.lt.s32.totalorder %s595_s17, 3 }
   0x5   : > { %s678_s18 = smov (%p28_p1, %s26_s18), 0  ;;  %p202_p3 = pnand %p510_p0, %p201_p2 }
   0x6   : > { %p246_p4 = scmp.lt.s32.totalorder (!%p202_p3), %s587_s15, 1  ;;  %v597_v0 = vmov (!%p202_p3), 0   ;;  %v287_v1 = vld [vmem:[%s672_s2] sm:$0xff] (!%p202_p3)  ;;  %vm342_vm0 = vcmask (!%p202_p3), 1043456   ;;  %vm338_vm1 = vcmask (!%p202_p3), 588800  }
   0x7   : > { %205 = sbr.rel (%p202_p3) target bundleno = 259 (0x103), region = 36  ;;  %381 = vmatprep.mubr.bf16.mxu0 (!%p202_p3), %v597_v0  ;;  %558 = vset.pattern.permute.xlu0 (!%p202_p3), %v597_v0  ;;  %v277_v14 = vld [vmem:[%s671_s1] sm:$0xf] (!%p202_p3) }
   0x8   : > { %290 = vperm.xlu0 (!%p202_p3), %558, %v287_v1  }
   0xe   : > { %s680_s15 = smov (!%p246_p4, %s587_s15), 1 }
   0xf   : > { %s532_s21 = smul.u32 72, %s680_s15  ;;  %s531_s5 = sshll.u32 %s680_s15, 4 }
  0x10   : > { %s512_s27 = smul.u32 96, %s680_s15  ;;  %s274_s8 = scalar_lea.vmem %s674_s4, %s531_s5 }
  0x11   : > { %s253_s24 = scalar_lea.vmem %s670_s0, %s532_s21 }
  0x12   : > { %v559_v2 = vld [vmem:[%s253_s24 + $0x4] ss:$8 sps:$4 sm:$0xff]   ;;  %v561_v3 = vld [vmem:[%s253_s24] ss:$8 sps:$4 sm:$0xff]   ;;  %v562_v4 = vld [vmem:[%s253_s24 + $0x14] ss:$8 sps:$4 sm:$0xff]   ;;  %s457_s30 = scalar_lea.vmem %s673_s3, %s512_s27 }
  0x13   : > { %349 = vmatprep.subr.bf16.mxu0 %v559_v2  ;;  %v564_v5 = vld [vmem:[%s253_s24 + $0x10] ss:$8 sps:$4 sm:$0xff]   ;;  %v565_v6 = vld [vmem:[%s253_s24 + $0x24] ss:$8 sps:$4 sm:$0xff]   ;;  %v567_v7 = vld [vmem:[%s253_s24 + $0x20] ss:$8 sps:$4 sm:$0xff]  }
  0x14   : > { %350 = vmatpush1.bf16.msra.mxu0 %v561_v3  ;;  %v568_v8 = vld [vmem:[%s253_s24 + $0x34] ss:$8 sps:$4 sm:$0xff]   ;;  %v286_v9 = vld [vmem:[%s253_s24 + $0x40] sm:$0xff]  ;;  %v570_v10 = vld [vmem:[%s253_s24 + $0x30] ss:$8 sps:$4 sm:$0xff]  }
  0x15   : > { %351 = vmatprep.subr.bf16.mxu0 %v562_v4  ;;  %v524_v11 = vcombine.high %v286_v9, %v286_v9  ;;  %v523_v12 = vcombine.low %v286_v9, %v286_v9  ;;  %v527_v17 = vld [vmem:[%s457_s30 + $0x50] sm:$0xff]  ;;  %v528_v20 = vld [vmem:[%s457_s30 + $0x58] sm:$0xff] }
  0x17   : > { %v344_v13 = vsel %vm342_vm0, %v523_v12, 0 }
  0x18   : > { %352 = vmatpush1.bf16.msra.mxu0 %v564_v5 }
  0x19   : > { %353 = vmatprep.subr.bf16.mxu0 %v565_v6 }
  0x1c   : > { %354 = vmatpush1.bf16.msra.mxu0 %v567_v7 }
  0x1d   : > { %355 = vmatprep.subr.bf16.mxu0 %v568_v8 }
  0x20   : > { %356 = vmatpush1.bf16.msra.mxu0 %v570_v10 }
  0x21   : > { %525 = vmatprep.subr.msk.bf16.mxu0 %vm342_vm0, %v524_v11 }
  0x24   : > { %358 = vmatpush1.bf16.msra.mxu0 %v344_v13 }
  0x27   : > { %526 = vmatmul.mubr.msk.bf16.vlgmr.msra.gmra.mrb[0].mxu0 %vm338_vm1, %v277_v14 }
  0x87   : > { %v291_v15 = vpop.permute.xlu0 %290 }
  0xfa   : > { %v383_v16 = vpop.f32.mrb[0].mxu0 }
  0xfb   : > { %v384_v18 = vadd.f32 %v383_v16, %v291_v15  ;;  %v385_v19 = vpop.f32.mrb[1].mxu0 }
  0xfc   : > { %v386_v21 = vadd.f32 %v385_v19, %v291_v15  ;;  %v387_v22 = vpop.f32.mrb[2].mxu0 }
  0xfd   : > { %v392_v23 = vadd.f32 %v527_v17, %v384_v18  ;;  %v388_v24 = vpop.f32.mrb[3].mxu0 }
  0xfe   : > { %v393_v25 = vadd.f32 %v528_v20, %v386_v21 }
  0xff   : > { %v394_v26 = vmax.f32 %v392_v23, 0.0 }
 0x100   : > { %v395_v27 = vmax.f32 %v393_v25, 0.0 }
 0x101   : > { %396 = vst [vmem:[%s274_s8] sm:$0xff] %v394_v26 }
 0x102   : > { %397 = vst [vmem:[%s274_s8 + $0x8] sm:$0xff] %v395_v27 }
 0x103 PF: > { %s14_s17 = sadd.s32 1, %s595_s17   ;;  %s675_s15 = smov %s591_s16 }
 0x104   : > { %p11_p5 = scmp.ge.s32.totalorder %s14_s17, 4   ;;  %s676_s16 = smov %s678_s18 }
 0x106   :  { %13 = sbr.rel (!%p11_p5) target bundleno = 2 (0x2), region = 69 }

// kernel: ham_forward.28
= control target key start
LH: loop header
LB: loop body
LE: loop exit
PB: predicated region body
PF: predicated region fallthrough
CT: control target
= control target key end

     0   :  { %s1000_s17 = smov 0   ;;  %s1087_s0 = inlined_call_operand.vmem [shape: bf16[2,360,256], index: 0, kind: input, shape index: {}]   ;;  %s1088_s1 = inlined_call_operand.vmem [shape: bf16[8,360], index: 1, kind: input, shape index: {}]   ;;  %s1089_s2 = inlined_call_operand.vmem [shape: f32[8,1], index: 2, kind: input, shape index: {}]   ;;  %s1090_s3 = inlined_call_operand.<no memory space> [shape: f32[1,1], index: 3, kind: input, shape index: {}]   ;;  %s1091_s4 = inlined_call_operand.vmem [shape: f32[2,8,256], index: 4, kind: output, shape index: {}]  }
   0x1   :  { %v9_v0 = vstv %s1090_s3 }
   0x2   :  { %10 = vst [vmem:[#allocation2] sm:$0x1] %v9_v0 }
   0x3 LB: > { %s806_s18 = sadd.s32 4294967295, %s968_s17   ;;  %p810_p0 = scmp.ge.s32.totalorder %s968_s17, 1  ;;  %s968_s17 = sphi %s1000_s17, %s16_s17  }
   0x4   : > { %p164_p1 = scmp.lt.s32.totalorder %s968_s17, 3 }
   0x6   : > { %p165_p2 = pnand %p810_p0, %p164_p1 }
   0x7   : > { %p190_p3 = scmp.lt.s32.totalorder (!%p165_p2), %s806_s18, 1  ;;  %v1011_v1 = vld [vmem:[%s1088_s1] sm:$0xff] (!%p165_p2)  ;;  %v970_v2 = vmov (!%p165_p2), 0   ;;  %vm493_vm0 = vcmask (!%p165_p2), 1043456   ;;  %v957_v43 = vld [vmem:[%s1088_s1 + $0x8] ss:$0 sps:$4 sm:$0xff] (!%p165_p2)  }
   0x8   : > { %168 = sbr.rel (%p165_p2) target bundleno = 1194 (0x4aa), region = 36  ;;  %573 = vmatprep.mubr.bf16.mxu1 (!%p165_p2), %v970_v2  ;;  %v815_v3 = vcombine.high (!%p165_p2), %v1011_v1, %v1011_v1  ;;  %886 = vset.pattern.permute.xlu0 (!%p165_p2), %v970_v2  ;;  %v248_v4 = vld [vmem:[%s1089_s2] sm:$0xff] (!%p165_p2)  ;;  %vm489_vm1 = vcmask (!%p165_p2), 850944   ;;  %v814_v54 = vcombine.low (!%p165_p2), %v1011_v1, %v1011_v1  ;;  %vm652_vm2 = vcmask (!%p165_p2), 64512  }
   0x9   : > { %251 = vperm.xlu0 (!%p165_p2), %886, %v248_v4  }
   0xa   : > { %532 = vmatprep.mubr.bf16.mxu0 (!%p165_p2), %v815_v3 }
   0xf   : > { %s1093_s18 = smov (!%p190_p3, %s806_s18), 1 }
  0x10   : > { %s873_s22 = smul.u32 360, %s1093_s18  ;;  %s868_s29 = sshll.u32 %s1093_s18, 4 }
  0x11   : > { %s199_s6 = scalar_lea.vmem %s1091_s4, %s868_s29 }
  0x12   : > { %s1024_s25 = scalar_lea.vmem %s1087_s0, %s873_s22 }
  0x13   : > { %v887_v5 = vld [vmem:[%s1024_s25 + $0x4] ss:$8 sps:$4 sm:$0xff]   ;;  %v889_v6 = vld [vmem:[%s1024_s25] ss:$8 sps:$4 sm:$0xff]   ;;  %v890_v7 = vld [vmem:[%s1024_s25 + $0x14] ss:$8 sps:$4 sm:$0xff]  }
  0x14   : > { %500 = vmatprep.subr.bf16.mxu0 %v887_v5  ;;  %v892_v8 = vld [vmem:[%s1024_s25 + $0x10] ss:$8 sps:$4 sm:$0xff]   ;;  %v893_v9 = vld [vmem:[%s1024_s25 + $0x24] ss:$8 sps:$4 sm:$0xff]   ;;  %v895_v10 = vld [vmem:[%s1024_s25 + $0x20] ss:$8 sps:$4 sm:$0xff]  }
  0x15   : > { %501 = vmatpush1.bf16.msra.mxu0 %v889_v6  ;;  %v896_v11 = vld [vmem:[%s1024_s25 + $0x34] ss:$8 sps:$4 sm:$0xff]   ;;  %v898_v12 = vld [vmem:[%s1024_s25 + $0x30] ss:$8 sps:$4 sm:$0xff]   ;;  %v899_v13 = vld [vmem:[%s1024_s25 + $0x44] ss:$8 sps:$4 sm:$0xff]  }
  0x16   : > { %502 = vmatprep.subr.bf16.mxu0 %v890_v7  ;;  %v914_v14 = vld [vmem:[%s1024_s25 + $0x104] ss:$8 sps:$4 sm:$0xff]   ;;  %v901_v15 = vld [vmem:[%s1024_s25 + $0x40] ss:$8 sps:$4 sm:$0xff]   ;;  %v920_v17 = vld [vmem:[%s1024_s25 + $0x114] ss:$8 sps:$4 sm:$0xff]  }
  0x17   : > { %541 = vmatprep.subr.bf16.mxu1 %v914_v14  ;;  %v918_v16 = vld [vmem:[%s1024_s25 + $0x100] ss:$8 sps:$4 sm:$0xff]   ;;  %v902_v18 = vld [vmem:[%s1024_s25 + $0x54] ss:$8 sps:$4 sm:$0xff]   ;;  %v924_v19 = vld [vmem:[%s1024_s25 + $0x110] ss:$8 sps:$4 sm:$0xff]  }
  0x18   : > { %542 = vmatpush1.bf16.msra.mxu1 %v918_v16  ;;  %v926_v20 = vld [vmem:[%s1024_s25 + $0x124] ss:$8 sps:$4 sm:$0xff]   ;;  %v904_v21 = vld [vmem:[%s1024_s25 + $0x50] ss:$8 sps:$4 sm:$0xff]   ;;  %v930_v23 = vld [vmem:[%s1024_s25 + $0x120] ss:$8 sps:$4 sm:$0xff]  }
  0x19   : > { %503 = vmatpush1.bf16.msra.mxu0 %v892_v8  ;;  %543 = vmatprep.subr.bf16.mxu1 %v920_v17  ;;  %v905_v22 = vld [vmem:[%s1024_s25 + $0x64] ss:$8 sps:$4 sm:$0xff]   ;;  %v932_v24 = vld [vmem:[%s1024_s25 + $0x134] ss:$8 sps:$4 sm:$0xff]   ;;  %v907_v25 = vld [vmem:[%s1024_s25 + $0x60] ss:$8 sps:$4 sm:$0xff]  }
  0x1a   : > { %504 = vmatprep.subr.bf16.mxu0 %v893_v9  ;;  %v908_v26 = vld [vmem:[%s1024_s25 + $0x74] ss:$8 sps:$4 sm:$0xff]   ;;  %v936_v27 = vld [vmem:[%s1024_s25 + $0x130] ss:$8 sps:$4 sm:$0xff]   ;;  %v938_v28 = vld [vmem:[%s1024_s25 + $0x144] ss:$8 sps:$4 sm:$0xff]  }
  0x1b   : > { %v910_v29 = vld [vmem:[%s1024_s25 + $0x70] ss:$8 sps:$4 sm:$0xff]   ;;  %v911_v30 = vld [vmem:[%s1024_s25 + $0x84] ss:$8 sps:$4 sm:$0xff]   ;;  %v942_v31 = vld [vmem:[%s1024_s25 + $0x140] ss:$8 sps:$4 sm:$0xff]  }
  0x1c   : > { %544 = vmatpush1.bf16.msra.mxu1 %v924_v19  ;;  %v944_v32 = vld [vmem:[%s1024_s25 + $0x154] ss:$8 sps:$4 sm:$0xff]   ;;  %v247_v33 = vld [vmem:[%s1024_s25 + $0x160] sm:$0xff]  ;;  %v948_v36 = vld [vmem:[%s1024_s25 + $0x150] ss:$8 sps:$4 sm:$0xff]  }
  0x1d   : > { %505 = vmatpush1.bf16.msra.mxu0 %v895_v10  ;;  %545 = vmatprep.subr.bf16.mxu1 %v926_v20  ;;  %v913_v34 = vld [vmem:[%s1024_s25 + $0x80] ss:$8 sps:$4 sm:$0xff]   ;;  %v916_v35 = vld [vmem:[%s1024_s25 + $0x94] ss:$8 sps:$4 sm:$0xff]   ;;  %v862_v37 = vcombine.high %v247_v33, %v247_v33  ;;  %v861_v38 = vcombine.low %v247_v33, %v247_v33  ;;  %v919_v39 = vld [vmem:[%s1024_s25 + $0x90] ss:$8 sps:$4 sm:$0xff]  }
  0x1e   : > { %506 = vmatprep.subr.bf16.mxu0 %v896_v11  ;;  %v922_v40 = vld [vmem:[%s1024_s25 + $0xa4] ss:$8 sps:$4 sm:$0xff]   ;;  %v925_v42 = vld [vmem:[%s1024_s25 + $0xa0] ss:$8 sps:$4 sm:$0xff]   ;;  %v928_v44 = vld [vmem:[%s1024_s25 + $0xb4] ss:$8 sps:$4 sm:$0xff]  }
  0x1f   : > { %v495_v41 = vsel %vm493_vm0, %v861_v38, 0  ;;  %v931_v45 = vld [vmem:[%s1024_s25 + $0xb0] ss:$8 sps:$4 sm:$0xff]   ;;  %v934_v46 = vld [vmem:[%s1024_s25 + $0xc4] ss:$8 sps:$4 sm:$0xff]  }
  0x20   : > { %546 = vmatpush1.bf16.msra.mxu1 %v930_v23  ;;  %v937_v47 = vld [vmem:[%s1024_s25 + $0xc0] ss:$8 sps:$4 sm:$0xff]   ;;  %v940_v48 = vld [vmem:[%s1024_s25 + $0xd4] ss:$8 sps:$4 sm:$0xff]   ;;  %v943_v49 = vld [vmem:[%s1024_s25 + $0xd0] ss:$8 sps:$4 sm:$0xff]  }
  0x21   : > { %507 = vmatpush1.bf16.msra.mxu0 %v898_v12  ;;  %547 = vmatprep.subr.bf16.mxu1 %v932_v24  ;;  %v946_v50 = vld [vmem:[%s1024_s25 + $0xe4] ss:$8 sps:$4 sm:$0xff]   ;;  %v949_v51 = vld [vmem:[%s1024_s25 + $0xe0] ss:$8 sps:$4 sm:$0xff]   ;;  %v951_v52 = vld [vmem:[%s1024_s25 + $0xf4] ss:$8 sps:$4 sm:$0xff]  }
  0x22   : > { %508 = vmatprep.subr.bf16.mxu0 %v899_v13  ;;  %v954_v53 = vld [vmem:[%s1024_s25 + $0xf0] ss:$8 sps:$4 sm:$0xff]   ;;  %v742_v16 = vld [vmem:[#allocation2] sm:$0x1] }
  0x23   : > { %874 = vpush %v742_v16 }
  0x24   : > { %548 = vmatpush1.bf16.msra.mxu1 %v936_v27 }
  0x25   : > { %509 = vmatpush1.bf16.msra.mxu0 %v901_v15  ;;  %549 = vmatprep.subr.bf16.mxu1 %v938_v28  ;;  %v971_v15 = vmov 0.0  }
  0x26   : > { %510 = vmatprep.subr.bf16.mxu0 %v902_v18 }
  0x28   : > { %550 = vmatpush1.bf16.msra.mxu1 %v942_v31 }
  0x29   : > { %511 = vmatpush1.bf16.msra.mxu0 %v904_v21  ;;  %551 = vmatprep.subr.bf16.mxu1 %v944_v32 }
  0x2a   : > { %512 = vmatprep.subr.bf16.mxu0 %v905_v22 }
  0x2c   : > { %552 = vmatpush1.bf16.msra.mxu1 %v948_v36 }
  0x2d   : > { %513 = vmatpush1.bf16.msra.mxu0 %v907_v25  ;;  %863 = vmatprep.subr.msk.bf16.mxu1 %vm493_vm0, %v862_v37 }
  0x2e   : > { %514 = vmatprep.subr.bf16.mxu0 %v908_v26 }
  0x30   : > { %554 = vmatpush1.bf16.msra.mxu1 %v495_v41 }
  0x31   : > { %515 = vmatpush1.bf16.msra.mxu0 %v910_v29 }
  0x32   : > { %516 = vmatprep.subr.bf16.mxu0 %v911_v30 }
  0x33   : > { %864 = vmatmul.mubr.msk.bf16.vlgmr.msra.gmra.mrb[0].mxu1 %vm489_vm1, %v957_v43 }
  0x35   : > { %517 = vmatpush1.bf16.msra.mxu0 %v913_v34 }
  0x36   : > { %518 = vmatprep.subr.bf16.mxu0 %v916_v35 }
  0x39   : > { %519 = vmatpush1.bf16.msra.mxu0 %v919_v39 }
  0x3a   : > { %520 = vmatprep.subr.bf16.mxu0 %v922_v40 }
  0x3d   : > { %521 = vmatpush1.bf16.msra.mxu0 %v925_v42 }
  0x3e   : > { %522 = vmatprep.subr.bf16.mxu0 %v928_v44 }
  0x41   : > { %523 = vmatpush1.bf16.msra.mxu0 %v931_v45 }
  0x42   : > { %524 = vmatprep.subr.bf16.mxu0 %v934_v46 }
  0x45   : > { %525 = vmatpush1.bf16.msra.mxu0 %v937_v47 }
  0x46   : > { %526 = vmatprep.subr.bf16.mxu0 %v940_v48 }
  0x49   : > { %527 = vmatpush1.bf16.msra.mxu0 %v943_v49 }
  0x4a   : > { %528 = vmatprep.subr.bf16.mxu0 %v946_v50 }
  0x4d   : > { %529 = vmatpush1.bf16.msra.mxu0 %v949_v51 }
  0x4e   : > { %530 = vmatprep.subr.bf16.mxu0 %v951_v52 }
  0x51   : > { %531 = vmatpush1.bf16.msra.mxu0 %v954_v53 }
  0x54   : > { %533 = vmatmul.mubr.bf16.vlgmr.msra.gmra.mrb[0].mxu0 %v814_v54  ;;  %s875_s28 = spop %874 }
  0x55   : > { %v744_v20 = vstv %s875_s28 }
  0x88   : > { %v252_v59 = vpop.permute.xlu0 %251 }
 0x106   : > { %v575_v55 = vpop.f32.mrb[0].mxu1 }
 0x107   : > { %v577_v56 = vpop.f32.mrb[1].mxu1 }
 0x108   : > { %v579_v57 = vpop.f32.mrb[2].mxu1 }
 0x109   : > { %v580_v58 = vpop.f32.mrb[3].mxu1 }
 0x127   : > { %v534_v60 = vpop.f32.mrb[0].mxu0 }
 0x128   : > { %v535_v61 = vadd.f32 %v534_v60, %v252_v59  ;;  %v536_v62 = vpop.f32.mrb[1].mxu0 }
 0x129   : > { %v537_v63 = vadd.f32 %v536_v62, %v252_v59  ;;  %v538_v0 = vpop.f32.mrb[2].mxu0 }
 0x12a   : > { %v576_v2 = vadd.f32 %v575_v55, %v535_v61  ;;  %v539_v3 = vpop.f32.mrb[3].mxu0 }
 0x12b   : > { %v578_v4 = vadd.f32 %v577_v56, %v537_v63 }
 0x12d   : > { %582 = vmatprep.subr.mxu1 %v578_v4  ;;  %646 = vmatprep.mubr.f32.mxu1 %v578_v4 }
 0x12e   : > { %583 = vmatpush1.xpose.msra.mxu1 %v576_v2 }
 0x12f   : > { %671 = vmatprep.subr.mxu1 %v578_v4 }
 0x131   : > { %647 = vmatmul.mubr.f32.vlgmr.msra.gmra.mrb[4].mxu1 %v576_v2 }
 0x132   : > { %672 = vmatpush1.msra.mxu1 %v576_v2  ;;  %735 = vmatprep.mubr.f32.mxu1 %v971_v15 }
 0x204   : > { %v648_v1 = vpop.f32.mrb[4].mxu1 }
 0x205   : > { %v650_v5 = vpop.f32.mrb[5].mxu1  ;;  %v653_v6 = vsel %vm652_vm2, %v648_v1, -inf }
 0x206   : > { %654 = vmax.xlane.f32.xlu0 %v653_v6 }
 0x293   : > { %v655_v7 = vpop.xlane.xlu0 %654 }
 0x294   : > { %v656_v8 = vsub.f32 %v655_v7, %v648_v1 }
 0x296   : > { %v657_v9 = vsel %vm652_vm2, %v656_v8, -inf }
 0x297   : > { %658 = vmax.xlane.f32.xlu1 %v657_v9 }
 0x324   : > { %v659_v10 = vpop.xlane.xlu1 %658 }
 0x325   : > { %v660_v11 = vsub.f32 %v656_v8, %v659_v10 }
 0x327   : > { %v661_v12 = vmul.f32 1.442695, %v660_v11 }
 0x329   : > { %958 = vpow2.f32 %v661_v12 }
 0x333   : > { %v959_v13 = vpop.eup %958 }
 0x334   : > { %v663_v14 = vsel %vm652_vm2, %v959_v13, 0.0 }
 0x335   : > { %664 = vadd.xlane.f32.xlu1 %v663_v14 }
 0x3c2   : > { %v665_v17 = vpop.xlane.xlu1 %664 }
 0x3c3   : > { %960 = vrcp.f32 %v665_v17 }
 0x3cd   : > { %v961_v18 = vpop.eup %960 }
 0x3ce   : > { %v667_v19 = vmul.f32 %v961_v18, %v959_v13 }
 0x3d0   : > { %865 = vmatmul.mubr.msk.f32.vlgmr.msra.gmra.mrb[6].mxu1 %vm652_vm2, %v667_v19 }
 0x4a3   : > { %v737_v21 = vpop.f32.mrb[6].mxu1 }
 0x4a4   : > { %v745_v22 = vmul.f32 %v744_v20, %v737_v21  ;;  %v739_v23 = vpop.f32.mrb[7].mxu1 }
 0x4a5   : > { %v746_v24 = vmul.f32 %v744_v20, %v739_v23 }
 0x4a6   : > { %v747_v25 = vadd.f32 %v745_v22, %v576_v2 }
 0x4a7   : > { %v748_v26 = vadd.f32 %v746_v24, %v578_v4 }
 0x4a8   : > { %749 = vst [vmem:[%s199_s6] sm:$0xff] %v747_v25 }
 0x4a9   : > { %750 = vst [vmem:[%s199_s6 + $0x8] sm:$0xff] %v748_v26 }
 0x4aa PF: > { %s16_s17 = sadd.s32 1, %s968_s17  }
 0x4ab   : > { %p13_p4 = scmp.ge.s32.totalorder %s16_s17, 4  }
 0x4ad   :  { %15 = sbr.rel (!%p13_p4) target bundleno = 3 (0x3), region = 66 }

</bundles_post_ra>
